<compile_context>
chip_gen: v7x
topology: tpu7x:2x2x1
jax: 0.10.0
libtpu: 0.0.40
codegen_flags: <defaults>
</compile_context>

<pallas_src>
import functools

import jax
import jax.numpy as jnp
import numpy as np
from jax import lax
from jax.experimental import pallas as pl
from jax.experimental.pallas import tpu as pltpu


# ----------------------------- fused Pallas kernel --------------------------

def _fused_forward_kernel(xp_ref, xa_ref, mask_ref,
                          w_obs_ref, p_obs_ref,
                          w_act_ref, p_act_ref,
                          w0_ref, b0_ref,
                          w1_ref, b1_ref,
                          w2_ref, b2_ref,
                          w3_ref, b3_ref,
                          o_ref, *, B, Ho, Wo):
    """Whole PoolingRewardDecoder forward on VMEM-resident data.

    Row layout: activations are (rows, channels) with rows = flattened
    (b, i, j) pixels of the 10x10-strided encoder grid, zero-padded at the
    bottom by 2*PAD rows so both valid 3x3 convs read purely static,
    in-bounds row windows.  Rows whose (i, j) lie outside a conv's valid
    output region hold garbage and are masked out before the max-pool.

    xp:    (N + 2*PAD, 300)   obs 10x10 patches, columns ordered (cin, ki, kj)
    xa:    (N + 2*PAD, A)     action pixels
    mask:  (N, 1)             0 for valid pool rows, -3e38 otherwise
    p_*:   (3, C)             packed [conv bias, bn scale, bn shift]
    w0/w3: (9*Cin, Cout)      prepacked 3x3 conv weights (im2col row order)
    b*:    (1, Cout)          biases (previous layer's BN pre-folded in)
    o:     (B, 16)            globally max-pooled logits
    """
    S = Ho * Wo
    N = B * S
    PAD = 2 * Wo + 2                       # largest 3x3 tap offset on flat rows

    def mm(a, b):
        return jnp.dot(a, b, preferred_element_type=jnp.float32)

    def bias_relu_bn(y, p):                # p rows: [bias, bn_scale, bn_shift]
        return jnp.maximum(y + p[0:1, :], 0.0) * p[1:2, :] + p[2:3, :]

    def conv3x3(x, w_ref, b_ref, rows_out):
        # In-register im2col: 9 statically shifted row-windows of x, one lane
        # concat, then a single MXU matmul against the (9*Cin, Cout) weight.
        taps = [x[dy * Wo + dx:dy * Wo + dx + rows_out, :]
                for dy in range(3) for dx in range(3)]
        patches = jnp.concatenate(taps, axis=-1)          # (rows_out, 9*Cin)
        return mm(patches, w_ref[...]) + b_ref[...]

    # --- encoders: Conv + bias + ReLU + BN(scale, shift); residual add ------
    enc_obs = bias_relu_bn(mm(xp_ref[...], w_obs_ref[...]), p_obs_ref[...])
    enc_act = bias_relu_bn(mm(xa_ref[...], w_act_ref[...]), p_act_ref[...])
    state = enc_act + enc_obs                             # (N + 2*PAD, C)

    # --- network (post-ReLU BN of each layer folded into the next W/b) ------
    h = jnp.maximum(conv3x3(state, w0_ref, b0_ref, N + PAD), 0.0)    # 3x3
    h = jnp.maximum(mm(h, w1_ref[...]) + b1_ref[...], 0.0)           # 1x1
    h = jnp.maximum(mm(h, w2_ref[...]) + b2_ref[...], 0.0)           # 1x1
    nin = conv3x3(h, w3_ref, b3_ref, N)                              # 3x3 -> (N, 16)

    # --- global spatial max-pool over the valid (Ho-4) x (Wo-4) region ------
    masked = nin + mask_ref[...]                          # additive -3e38 mask
    pooled = [jnp.max(masked[b * S:(b + 1) * S, :], axis=0, keepdims=True)
              for b in range(B)]
    o_ref[...] = jnp.concatenate(pooled, axis=0)


# ----------------------------- host-side glue --------------------------------

def prepare_params(params, eps=1e-5):
    """One-time parameter prep (outside the per-call path):
      * eval-mode BatchNorm folded to (scale, shift); net0/net1/net2's BN is
        further folded into the *next* layer's weight & bias,
      * conv weights flattened for matmul; 3x3 convs prepacked as
        (9*Cin, Cout) in im2col (dy, dx, cin) row order,
      * obs conv weight row-reordered to (cin, ki, kj) so the wrapper
        patchifies NCHW observations with a single transpose."""
    f32 = lambda a: jnp.asarray(a, jnp.float32)

    def bn(p):
        s = f32(p["gamma"]) / jnp.sqrt(f32(p["var"]) + eps)
        return s, f32(p["beta"]) - f32(p["mean"]) * s

    def flat(p):                           # HWIO -> (kh*kw*cin, cout)
        w = f32(p["w"])
        return w.reshape(-1, w.shape[-1])

    s_obs, t_obs = bn(params["obs"])
    s_act, t_act = bn(params["act"])
    s0, t0 = bn(params["net0"])
    s1, t1 = bn(params["net1"])
    s2, t2 = bn(params["net2"])

    w_obs = f32(params["obs"]["w"]).transpose(2, 0, 1, 3)   # (cin, kh, kw, cout)
    w_obs = w_obs.reshape(-1, w_obs.shape[-1])

    w1_raw = flat(params["net1"])
    w2_raw = flat(params["net2"])
    w3_raw = flat(params["net3"])

    return {
        "w_obs": w_obs,
        "p_obs": jnp.stack([f32(params["obs"]["b"]), s_obs, t_obs]),
        "w_act": flat(params["act"]),
        "p_act": jnp.stack([f32(params["act"]["b"]), s_act, t_act]),
        "w0": flat(params["net0"]),
        "b0": f32(params["net0"]["b"]).reshape(1, -1),
        "w1": w1_raw * s0[:, None],
        "b1": (t0 @ w1_raw + f32(params["net1"]["b"])).reshape(1, -1),
        "w2": w2_raw * s1[:, None],
        "b2": (t1 @ w2_raw + f32(params["net2"]["b"])).reshape(1, -1),
        "w3": w3_raw * jnp.tile(s2, 9)[:, None],
        "b3": (jnp.tile(t2, 9) @ w3_raw + f32(params["net3"]["b"])).reshape(1, -1),
    }


@jax.jit
def pooling_reward_decoder_forward(prepped, observation, actions):
    """observation: (B, 3, H, W) NCHW;  actions: (B, A, H//10, W//10) NCHW."""
    B, c_in, H, W = observation.shape
    if c_in != 3:
        raise ValueError(f"observation must have 3 channels, got {c_in}")
    if H % 10 != 0 or W % 10 != 0:
        raise ValueError(f"H and W must be divisible by 10, got {(H, W)}")
    Ho, Wo = H // 10, W // 10
    if Ho < 5 or Wo < 5:
        raise ValueError("encoded grid must be at least 5x5 "
                         f"(two valid 3x3 convs + pool), got {(Ho, Wo)}")
    if actions.shape[0] != B or actions.shape[2:] != (Ho, Wo):
        raise ValueError(f"actions must be (B, A, {Ho}, {Wo}), got {actions.shape}")
    A = actions.shape[1]
    C = prepped["w_obs"].shape[1]
    K_obs = 3 * 10 * 10
    S, N, PAD = Ho * Wo, B * Ho * Wo, 2 * Wo + 2

    # observation NCHW -> (N, 300) patch matrix, columns ordered (cin, ki, kj)
    xp = observation.astype(jnp.float32).reshape(B, 3, Ho, 10, Wo, 10)
    xp = xp.transpose(0, 2, 4, 1, 3, 5).reshape(N, K_obs)
    xa = actions.astype(jnp.float32).transpose(0, 2, 3, 1).reshape(N, A)
    # zero-pad the flattened pixel axis so both valid 3x3 convs read in-bounds
    xp = jnp.pad(xp, ((0, 2 * PAD), (0, 0)))
    xa = jnp.pad(xa, ((0, 2 * PAD), (0, 0)))

    # additive mask selecting the valid (Ho-4)x(Wo-4) pool region (trace-time const)
    pix = np.arange(N) % S
    valid = (pix // Wo < Ho - 4) & (pix % Wo < Wo - 4)
    pool_mask = jnp.asarray(np.where(valid, 0.0, -3e38)[:, None], jnp.float32)

    args = (xp, xa, pool_mask,
            prepped["w_obs"], prepped["p_obs"],
            prepped["w_act"], prepped["p_act"],
            prepped["w0"], prepped["b0"],
            prepped["w1"], prepped["b1"],
            prepped["w2"], prepped["b2"],
            prepped["w3"], prepped["b3"])

    flops = 2 * ((N + 2 * PAD) * (K_obs * C + A * C)
                 + (N + PAD) * (9 * C * C + C * (C // 2) + (C // 2) * (C // 4))
                 + N * 9 * (C // 4) * 16)
    nbytes = 4 * (sum(int(np.prod(a.shape)) for a in args) + B * 16)

    pooled = pl.pallas_call(
        functools.partial(_fused_forward_kernel, B=B, Ho=Ho, Wo=Wo),
        out_shape=jax.ShapeDtypeStruct((B, 16), jnp.float32),
        in_specs=[pl.BlockSpec(memory_space=pltpu.MemorySpace.VMEM)] * len(args),
        out_specs=pl.BlockSpec(memory_space=pltpu.MemorySpace.VMEM),
        cost_estimate=pl.CostEstimate(flops=flops, transcendentals=0,
                                      bytes_accessed=nbytes),
    )(*args)
    return pooled.reshape(-1, 2, 8)


# ----------------------------- pure-JAX reference ---------------------------

def _conv(x, w, b, stride=1):
    y = lax.conv_general_dilated(
        x, w, (stride, stride), "VALID",
        dimension_numbers=("NHWC", "HWIO", "NHWC"),
        precision=lax.Precision.HIGHEST)
    return y + b


def _bn(x, p, eps=1e-5):
    return (x - p["mean"]) / jnp.sqrt(p["var"] + eps) * p["gamma"] + p["beta"]


def reference_forward(params, observation, actions):
    obs = jnp.transpose(observation, (0, 2, 3, 1))
    act = jnp.transpose(actions, (0, 2, 3, 1))
    p = params["obs"]
    eo = _bn(jax.nn.relu(_conv(obs, p["w"], p["b"], stride=10)), p)
    p = params["act"]
    ea = _bn(jax.nn.relu(_conv(act, p["w"], p["b"])), p)
    h = ea + eo
    for name in ("net0", "net1", "net2"):
        p = params[name]
        h = _bn(jax.nn.relu(_conv(h, p["w"], p["b"])), p)
    p = params["net3"]
    nin = _conv(h, p["w"], p["b"])
    pooled = jnp.max(nin, axis=(1, 2))
    return pooled.reshape(-1, 2, 8)


# ----------------------------- parameter init -------------------------------

def init_params(key, num_actions, state_channels):
    def conv_params(k, kh, kw, cin, cout, bn=True):
        k1, k2, k3, k4, k5, k6 = jax.random.split(k, 6)
        p = {
            "w": 0.1 * jax.random.normal(k1, (kh, kw, cin, cout), jnp.float32),
            "b": 0.1 * jax.random.normal(k2, (cout,), jnp.float32),
        }
        if bn:
            p.update(
                gamma=1.0 + 0.1 * jax.random.normal(k3, (cout,), jnp.float32),
                beta=0.1 * jax.random.normal(k4, (cout,), jnp.float32),
                mean=0.1 * jax.random.normal(k5, (cout,), jnp.float32),
                var=jnp.abs(jax.random.normal(k6, (cout,), jnp.float32)) + 0.5,
            )
        return p

    C = state_channels
    ks = jax.random.split(key, 6)
    return {
        "obs": conv_params(ks[0], 10, 10, 3, C),
        "act": conv_params(ks[1], 1, 1, num_actions, C),
        "net0": conv_params(ks[2], 3, 3, C, C),
        "net1": conv_params(ks[3], 1, 1, C, C // 2),
        "net2": conv_params(ks[4], 1, 1, C // 2, C // 4),
        "net3": conv_params(ks[5], 3, 3, C // 4, 16, bn=False),
    }


# ----------------------------- main ------------------------------------------

if __name__ == "__main__":
    key = jax.random.PRNGKey(0)
    num_actions, state_channels = 4, 8
    B, H, W = 2, 60, 60                      # encoded spatial = 6x6 -> 4x4 -> 2x2
    kp, ko, ka = jax.random.split(key, 3)
    params = init_params(kp, num_actions, state_channels)
    observation = jax.random.normal(ko, (B, 3, H, W), jnp.float32)
    actions = jax.random.normal(ka, (B, num_actions, H // 10, W // 10), jnp.float32)

    prepped = prepare_params(params)         # one-time: fold BN, prepack weights
    out = pooling_reward_decoder_forward(prepped, observation, actions)
    out = jax.block_until_ready(out)
    assert out.shape == (B, 2, 8), out.shape

    ref = reference_forward(params, observation, actions)
    np.testing.assert_allclose(np.asarray(out), np.asarray(ref),
                               rtol=1e-3, atol=1e-3)
    print("KERNEL_OK")
</pallas_src>

<mosaic_0001>
module attributes {stable_mosaic.version = 11 : i64} {
  func.func @_fused_forward_kernel(%arg0: memref<100x300xf32, #tpu.memory_space<vmem>>, %arg1: memref<100x4xf32, #tpu.memory_space<vmem>>, %arg2: memref<72x1xf32, #tpu.memory_space<vmem>>, %arg3: memref<300x8xf32, #tpu.memory_space<vmem>>, %arg4: memref<3x8xf32, #tpu.memory_space<vmem>>, %arg5: memref<4x8xf32, #tpu.memory_space<vmem>>, %arg6: memref<3x8xf32, #tpu.memory_space<vmem>>, %arg7: memref<72x8xf32, #tpu.memory_space<vmem>>, %arg8: memref<1x8xf32, #tpu.memory_space<vmem>>, %arg9: memref<8x4xf32, #tpu.memory_space<vmem>>, %arg10: memref<1x4xf32, #tpu.memory_space<vmem>>, %arg11: memref<4x2xf32, #tpu.memory_space<vmem>>, %arg12: memref<1x2xf32, #tpu.memory_space<vmem>>, %arg13: memref<18x16xf32, #tpu.memory_space<vmem>>, %arg14: memref<1x16xf32, #tpu.memory_space<vmem>>, %arg15: memref<2x16xf32, #tpu.memory_space<vmem>>) attributes {dimension_semantics = [], scalar_prefetch = 0 : i64, scratch_operands = 0 : i64, tpu.core_type = #tpu.core_type<tc>} {
    %c0 = arith.constant 0 : index
    %c0_0 = arith.constant 0 : index
    %0 = vector.load %arg0[%c0, %c0_0] : memref<100x300xf32, #tpu.memory_space<vmem>>, vector<100x300xf32>
    %c0_1 = arith.constant 0 : index
    %c0_2 = arith.constant 0 : index
    %1 = vector.load %arg3[%c0_1, %c0_2] : memref<300x8xf32, #tpu.memory_space<vmem>>, vector<300x8xf32>
    %cst = arith.constant dense<0.000000e+00> : vector<100x8xf32>
    %2 = tpu.matmul %0, %1, %cst {dimension_numbers = #tpu.dot_dimension_numbers<[1], [0], [0], [1], [0, 0, 1, 1], [], []>} : vector<100x300xf32>, vector<300x8xf32>, vector<100x8xf32> -> vector<100x8xf32>
    %c0_3 = arith.constant 0 : index
    %c0_4 = arith.constant 0 : index
    %3 = vector.load %arg4[%c0_3, %c0_4] : memref<3x8xf32, #tpu.memory_space<vmem>>, vector<3x8xf32>
    %4 = vector.extract_strided_slice %3 {offsets = [0, 0], sizes = [1, 8], strides = [1, 1]} : vector<3x8xf32> to vector<1x8xf32>
    %5 = vector.broadcast %4 : vector<1x8xf32> to vector<100x8xf32>
    %6 = arith.addf %2, %5 : vector<100x8xf32>
    %cst_5 = arith.constant 0.000000e+00 : f32
    %7 = vector.broadcast %cst_5 : f32 to vector<100x8xf32>
    %8 = arith.maximumf %6, %7 : vector<100x8xf32>
    %9 = vector.extract_strided_slice %3 {offsets = [1, 0], sizes = [1, 8], strides = [1, 1]} : vector<3x8xf32> to vector<1x8xf32>
    %10 = vector.broadcast %9 : vector<1x8xf32> to vector<100x8xf32>
    %11 = arith.mulf %8, %10 : vector<100x8xf32>
    %12 = vector.extract_strided_slice %3 {offsets = [2, 0], sizes = [1, 8], strides = [1, 1]} : vector<3x8xf32> to vector<1x8xf32>
    %13 = vector.broadcast %12 : vector<1x8xf32> to vector<100x8xf32>
    %14 = arith.addf %11, %13 : vector<100x8xf32>
    %c0_6 = arith.constant 0 : index
    %c0_7 = arith.constant 0 : index
    %15 = vector.load %arg1[%c0_6, %c0_7] : memref<100x4xf32, #tpu.memory_space<vmem>>, vector<100x4xf32>
    %c0_8 = arith.constant 0 : index
    %c0_9 = arith.constant 0 : index
    %16 = vector.load %arg5[%c0_8, %c0_9] : memref<4x8xf32, #tpu.memory_space<vmem>>, vector<4x8xf32>
    %cst_10 = arith.constant dense<0.000000e+00> : vector<100x8xf32>
    %17 = tpu.matmul %15, %16, %cst_10 {dimension_numbers = #tpu.dot_dimension_numbers<[1], [0], [0], [1], [0, 0, 1, 1], [], []>} : vector<100x4xf32>, vector<4x8xf32>, vector<100x8xf32> -> vector<100x8xf32>
    %c0_11 = arith.constant 0 : index
    %c0_12 = arith.constant 0 : index
    %18 = vector.load %arg6[%c0_11, %c0_12] : memref<3x8xf32, #tpu.memory_space<vmem>>, vector<3x8xf32>
    %19 = vector.extract_strided_slice %18 {offsets = [0, 0], sizes = [1, 8], strides = [1, 1]} : vector<3x8xf32> to vector<1x8xf32>
    %20 = vector.broadcast %19 : vector<1x8xf32> to vector<100x8xf32>
    %21 = arith.addf %17, %20 : vector<100x8xf32>
    %cst_13 = arith.constant 0.000000e+00 : f32
    %22 = vector.broadcast %cst_13 : f32 to vector<100x8xf32>
    %23 = arith.maximumf %21, %22 : vector<100x8xf32>
    %24 = vector.extract_strided_slice %18 {offsets = [1, 0], sizes = [1, 8], strides = [1, 1]} : vector<3x8xf32> to vector<1x8xf32>
    %25 = vector.broadcast %24 : vector<1x8xf32> to vector<100x8xf32>
    %26 = arith.mulf %23, %25 : vector<100x8xf32>
    %27 = vector.extract_strided_slice %18 {offsets = [2, 0], sizes = [1, 8], strides = [1, 1]} : vector<3x8xf32> to vector<1x8xf32>
    %28 = vector.broadcast %27 : vector<1x8xf32> to vector<100x8xf32>
    %29 = arith.addf %26, %28 : vector<100x8xf32>
    %30 = arith.addf %29, %14 : vector<100x8xf32>
    %31 = vector.extract_strided_slice %30 {offsets = [0, 0], sizes = [86, 8], strides = [1, 1]} : vector<100x8xf32> to vector<86x8xf32>
    %32 = vector.extract_strided_slice %30 {offsets = [1, 0], sizes = [86, 8], strides = [1, 1]} : vector<100x8xf32> to vector<86x8xf32>
    %33 = vector.extract_strided_slice %30 {offsets = [2, 0], sizes = [86, 8], strides = [1, 1]} : vector<100x8xf32> to vector<86x8xf32>
    %34 = vector.extract_strided_slice %30 {offsets = [6, 0], sizes = [86, 8], strides = [1, 1]} : vector<100x8xf32> to vector<86x8xf32>
    %35 = vector.extract_strided_slice %30 {offsets = [7, 0], sizes = [86, 8], strides = [1, 1]} : vector<100x8xf32> to vector<86x8xf32>
    %36 = vector.extract_strided_slice %30 {offsets = [8, 0], sizes = [86, 8], strides = [1, 1]} : vector<100x8xf32> to vector<86x8xf32>
    %37 = vector.extract_strided_slice %30 {offsets = [12, 0], sizes = [86, 8], strides = [1, 1]} : vector<100x8xf32> to vector<86x8xf32>
    %38 = vector.extract_strided_slice %30 {offsets = [13, 0], sizes = [86, 8], strides = [1, 1]} : vector<100x8xf32> to vector<86x8xf32>
    %39 = vector.extract_strided_slice %30 {offsets = [14, 0], sizes = [86, 8], strides = [1, 1]} : vector<100x8xf32> to vector<86x8xf32>
    %40 = tpu.concatenate %31, %32, %33, %34, %35, %36, %37, %38, %39 in 1 : vector<86x8xf32>, vector<86x8xf32>, vector<86x8xf32>, vector<86x8xf32>, vector<86x8xf32>, vector<86x8xf32>, vector<86x8xf32>, vector<86x8xf32>, vector<86x8xf32> -> vector<86x72xf32>
    %c0_14 = arith.constant 0 : index
    %c0_15 = arith.constant 0 : index
    %41 = vector.load %arg7[%c0_14, %c0_15] : memref<72x8xf32, #tpu.memory_space<vmem>>, vector<72x8xf32>
    %cst_16 = arith.constant dense<0.000000e+00> : vector<86x8xf32>
    %42 = tpu.matmul %40, %41, %cst_16 {dimension_numbers = #tpu.dot_dimension_numbers<[1], [0], [0], [1], [0, 0, 1, 1], [], []>} : vector<86x72xf32>, vector<72x8xf32>, vector<86x8xf32> -> vector<86x8xf32>
    %c0_17 = arith.constant 0 : index
    %c0_18 = arith.constant 0 : index
    %43 = vector.load %arg8[%c0_17, %c0_18] : memref<1x8xf32, #tpu.memory_space<vmem>>, vector<1x8xf32>
    %44 = vector.broadcast %43 : vector<1x8xf32> to vector<86x8xf32>
    %45 = arith.addf %42, %44 : vector<86x8xf32>
    %cst_19 = arith.constant 0.000000e+00 : f32
    %46 = vector.broadcast %cst_19 : f32 to vector<86x8xf32>
    %47 = arith.maximumf %45, %46 : vector<86x8xf32>
    %c0_20 = arith.constant 0 : index
    %c0_21 = arith.constant 0 : index
    %48 = vector.load %arg9[%c0_20, %c0_21] : memref<8x4xf32, #tpu.memory_space<vmem>>, vector<8x4xf32>
    %cst_22 = arith.constant dense<0.000000e+00> : vector<86x4xf32>
    %49 = tpu.matmul %47, %48, %cst_22 {dimension_numbers = #tpu.dot_dimension_numbers<[1], [0], [0], [1], [0, 0, 1, 1], [], []>} : vector<86x8xf32>, vector<8x4xf32>, vector<86x4xf32> -> vector<86x4xf32>
    %c0_23 = arith.constant 0 : index
    %c0_24 = arith.constant 0 : index
    %50 = vector.load %arg10[%c0_23, %c0_24] : memref<1x4xf32, #tpu.memory_space<vmem>>, vector<1x4xf32>
    %51 = vector.broadcast %50 : vector<1x4xf32> to vector<86x4xf32>
    %52 = arith.addf %49, %51 : vector<86x4xf32>
    %cst_25 = arith.constant 0.000000e+00 : f32
    %53 = vector.broadcast %cst_25 : f32 to vector<86x4xf32>
    %54 = arith.maximumf %52, %53 : vector<86x4xf32>
    %c0_26 = arith.constant 0 : index
    %c0_27 = arith.constant 0 : index
    %55 = vector.load %arg11[%c0_26, %c0_27] : memref<4x2xf32, #tpu.memory_space<vmem>>, vector<4x2xf32>
    %cst_28 = arith.constant dense<0.000000e+00> : vector<86x2xf32>
    %56 = tpu.matmul %54, %55, %cst_28 {dimension_numbers = #tpu.dot_dimension_numbers<[1], [0], [0], [1], [0, 0, 1, 1], [], []>} : vector<86x4xf32>, vector<4x2xf32>, vector<86x2xf32> -> vector<86x2xf32>
    %c0_29 = arith.constant 0 : index
    %c0_30 = arith.constant 0 : index
    %57 = vector.load %arg12[%c0_29, %c0_30] : memref<1x2xf32, #tpu.memory_space<vmem>>, vector<1x2xf32>
    %58 = vector.broadcast %57 : vector<1x2xf32> to vector<86x2xf32>
    %59 = arith.addf %56, %58 : vector<86x2xf32>
    %cst_31 = arith.constant 0.000000e+00 : f32
    %60 = vector.broadcast %cst_31 : f32 to vector<86x2xf32>
    %61 = arith.maximumf %59, %60 : vector<86x2xf32>
    %62 = vector.extract_strided_slice %61 {offsets = [0, 0], sizes = [72, 2], strides = [1, 1]} : vector<86x2xf32> to vector<72x2xf32>
    %63 = vector.extract_strided_slice %61 {offsets = [1, 0], sizes = [72, 2], strides = [1, 1]} : vector<86x2xf32> to vector<72x2xf32>
    %64 = vector.extract_strided_slice %61 {offsets = [2, 0], sizes = [72, 2], strides = [1, 1]} : vector<86x2xf32> to vector<72x2xf32>
    %65 = vector.extract_strided_slice %61 {offsets = [6, 0], sizes = [72, 2], strides = [1, 1]} : vector<86x2xf32> to vector<72x2xf32>
    %66 = vector.extract_strided_slice %61 {offsets = [7, 0], sizes = [72, 2], strides = [1, 1]} : vector<86x2xf32> to vector<72x2xf32>
    %67 = vector.extract_strided_slice %61 {offsets = [8, 0], sizes = [72, 2], strides = [1, 1]} : vector<86x2xf32> to vector<72x2xf32>
    %68 = vector.extract_strided_slice %61 {offsets = [12, 0], sizes = [72, 2], strides = [1, 1]} : vector<86x2xf32> to vector<72x2xf32>
    %69 = vector.extract_strided_slice %61 {offsets = [13, 0], sizes = [72, 2], strides = [1, 1]} : vector<86x2xf32> to vector<72x2xf32>
    %70 = vector.extract_strided_slice %61 {offsets = [14, 0], sizes = [72, 2], strides = [1, 1]} : vector<86x2xf32> to vector<72x2xf32>
    %71 = tpu.concatenate %62, %63, %64, %65, %66, %67, %68, %69, %70 in 1 : vector<72x2xf32>, vector<72x2xf32>, vector<72x2xf32>, vector<72x2xf32>, vector<72x2xf32>, vector<72x2xf32>, vector<72x2xf32>, vector<72x2xf32>, vector<72x2xf32> -> vector<72x18xf32>
    %c0_32 = arith.constant 0 : index
    %c0_33 = arith.constant 0 : index
    %72 = vector.load %arg13[%c0_32, %c0_33] : memref<18x16xf32, #tpu.memory_space<vmem>>, vector<18x16xf32>
    %cst_34 = arith.constant dense<0.000000e+00> : vector<72x16xf32>
    %73 = tpu.matmul %71, %72, %cst_34 {dimension_numbers = #tpu.dot_dimension_numbers<[1], [0], [0], [1], [0, 0, 1, 1], [], []>} : vector<72x18xf32>, vector<18x16xf32>, vector<72x16xf32> -> vector<72x16xf32>
    %c0_35 = arith.constant 0 : index
    %c0_36 = arith.constant 0 : index
    %74 = vector.load %arg14[%c0_35, %c0_36] : memref<1x16xf32, #tpu.memory_space<vmem>>, vector<1x16xf32>
    %75 = vector.broadcast %74 : vector<1x16xf32> to vector<72x16xf32>
    %76 = arith.addf %73, %75 : vector<72x16xf32>
    %c0_37 = arith.constant 0 : index
    %c0_38 = arith.constant 0 : index
    %77 = vector.load %arg2[%c0_37, %c0_38] : memref<72x1xf32, #tpu.memory_space<vmem>>, vector<72x1xf32>
    %78 = vector.broadcast %77 : vector<72x1xf32> to vector<72x16xf32>
    %79 = arith.addf %76, %78 : vector<72x16xf32>
    %80 = vector.extract_strided_slice %79 {offsets = [0, 0], sizes = [36, 16], strides = [1, 1]} : vector<72x16xf32> to vector<36x16xf32>
    %cst_39 = arith.constant dense<0xFF800000> : vector<16xf32>
    %81 = vector.multi_reduction <maximumf>, %80, %cst_39 [0] : vector<36x16xf32> to vector<16xf32>
    %82 = vector.shape_cast %81 : vector<16xf32> to vector<1x16xf32>
    %83 = vector.extract_strided_slice %79 {offsets = [36, 0], sizes = [36, 16], strides = [1, 1]} : vector<72x16xf32> to vector<36x16xf32>
    %cst_40 = arith.constant dense<0xFF800000> : vector<16xf32>
    %84 = vector.multi_reduction <maximumf>, %83, %cst_40 [0] : vector<36x16xf32> to vector<16xf32>
    %85 = vector.shape_cast %84 : vector<16xf32> to vector<1x16xf32>
    %86 = tpu.concatenate %82, %85 in 0 : vector<1x16xf32>, vector<1x16xf32> -> vector<2x16xf32>
    %c0_41 = arith.constant 0 : index
    %c0_42 = arith.constant 0 : index
    %87 = vector.load %arg15[%c0_41, %c0_42] : memref<2x16xf32, #tpu.memory_space<vmem>>, vector<2x16xf32>
    tpu.vector_store %arg15[%c0_41, %c0_42], %86 {strides = array<i32>} : memref<2x16xf32, #tpu.memory_space<vmem>>, vector<2x16xf32>,
    return
  }
}

</mosaic_0001>

<bundles_post_ra>
// kernel: pooling_reward_decoder_forward.1
= control target key start
LH: loop header
LB: loop body
LE: loop exit
PB: predicated region body
PF: predicated region fallthrough
CT: control target
= control target key end

     0   :  { %v3012_v0 = vmov 0.0|0.0   ;;  %vm3013_vm0 = vmmov 0   ;;  %v3014_v8 = vmov 0.0   ;;  %vm172_vm1 = vcmask 1043456   ;;  %s3016_s28 = smov 40   ;;  %s3017_s29 = smov 8   ;;  %s4599_s3 = inlined_call_operand.vmem [shape: f32[300,8], index: 3, kind: input, shape index: {}]   ;;  %s4600_s0 = inlined_call_operand.vmem [shape: f32[100,300], index: 0, kind: input, shape index: {}]   ;;  %s4601_s5 = inlined_call_operand.vmem [shape: f32[4,8], index: 5, kind: input, shape index: {}]   ;;  %s4602_s1 = inlined_call_operand.vmem [shape: f32[100,4], index: 1, kind: input, shape index: {}]   ;;  %s4603_s4 = inlined_call_operand.vmem [shape: f32[3,8], index: 4, kind: input, shape index: {}]   ;;  %s4604_s6 = inlined_call_operand.vmem [shape: f32[3,8], index: 6, kind: input, shape index: {}]   ;;  %s4605_s7 = inlined_call_operand.vmem [shape: f32[72,8], index: 7, kind: input, shape index: {}]   ;;  %s4606_s9 = inlined_call_operand.vmem [shape: f32[8,4], index: 9, kind: input, shape index: {}]   ;;  %s4607_s8 = inlined_call_operand.vmem [shape: f32[1,8], index: 8, kind: input, shape index: {}]   ;;  %s4608_s11 = inlined_call_operand.vmem [shape: f32[4,2], index: 11, kind: input, shape index: {}]   ;;  %s4609_s10 = inlined_call_operand.vmem [shape: f32[1,4], index: 10, kind: input, shape index: {}]   ;;  %s4610_s12 = inlined_call_operand.vmem [shape: f32[1,2], index: 12, kind: input, shape index: {}]   ;;  %s4611_s13 = inlined_call_operand.vmem [shape: f32[18,16], index: 13, kind: input, shape index: {}]   ;;  %s4612_s2 = inlined_call_operand.vmem [shape: f32[72,1], index: 2, kind: input, shape index: {}]   ;;  %s4613_s14 = inlined_call_operand.vmem [shape: f32[1,16], index: 14, kind: input, shape index: {}]   ;;  %s4614_s15 = inlined_call_operand.vmem [shape: f32[2,16], index: 15, kind: output, shape index: {}]  }
   0x1   :  { %2964 = vmatprep.subr.bf16.mxu1 %v3012_v0  ;;  %v105_v1 = vld [vmem:[%s4599_s3 + $0x80] sm:$0xff]  ;;  %v106_v2 = vld [vmem:[%s4599_s3 + $0x88] sm:$0xff]  ;;  %2698 = vmatprep.mubr.msk.f32.mxu1 %vm3013_vm0, %v3014_v8  ;;  %v107_v11 = vld [vmem:[%s4599_s3 + $0x90] sm:$0xff]  ;;  %vm3015_vm2 = vmmov 1   ;;  %vm132_vm4 = vcmask 359424   ;;  %vm4615_vm5 = vcmask 31744  }
   0x2   :  { %v121_v3 = vld [vmem:[%s4599_s3 + $0x100] sm:$0xff]  ;;  %v2932_v4 = vpack.c.bf16 %v106_v2, %v105_v1  ;;  %v122_v5 = vld [vmem:[%s4599_s3 + $0x108] sm:$0xff]  ;;  %v108_v12 = vld [vmem:[%s4599_s3 + $0x98] sm:$0xff]  ;;  %vm746_vm6 = vcmask 1046528   ;;  %vm857_vm7 = vcmask 1041408   ;;  %vm801_vm8 = vcmask 1045504  }
   0x3   :  { %v89_v6 = vld [vmem:[%s4599_s3] sm:$0xff]  ;;  %v90_v7 = vld [vmem:[%s4599_s3 + $0x8] sm:$0xff]  ;;  %v2965_v9 = vpack.c.bf16 %v122_v5, %v121_v3  ;;  %v123_v13 = vld [vmem:[%s4599_s3 + $0x110] sm:$0xff]  ;;  %v2936_v14 = vpack.c.bf16 %v108_v12, %v107_v11  ;;  %vm914_vm9 = vcmask 1040384   ;;  %s3018_s30 = smov 24   ;;  %s3019_s16 = smov 16  }
   0x4   :  { %v2934_v10 = vpack.c.bf16 %v90_v7, %v89_v6  ;;  %2933 = vmatprep.subr.bf16.mxu0 %v2932_v4  ;;  %v124_v15 = vld [vmem:[%s4599_s3 + $0x118] sm:$0xff]  ;;  %v91_v16 = vld [vmem:[%s4599_s3 + $0x10] sm:$0xff]  ;;  %v109_v20 = vld [vmem:[%s4599_s3 + $0xa0] sm:$0xff]  ;;  %s3021_s17 = smov 48   ;;  %vm1061_vm10 = vcmask 1042432   ;;  %s3023_s18 = smov 64  }
   0x5   :  { %v92_v17 = vld [vmem:[%s4599_s3 + $0x18] sm:$0xff]  ;;  %2966 = vmatpush3.bf16.msra.mxu1 %v2965_v9  ;;  %v2968_v18 = vpack.c.bf16 %v124_v15, %v123_v13  ;;  %v110_v21 = vld [vmem:[%s4599_s3 + $0xa8] sm:$0xff]  ;;  %v125_v23 = vld [vmem:[%s4599_s3 + $0x120] sm:$0xff]  ;;  %vm1153_vm11 = vcmask 64512   ;;  %vm1165_vm12 = vcmask 130048   ;;  %vm1177_vm13 = vcmask 195584  }
   0x6   :  { %2935 = vmatpush3.bf16.msra.mxu0 %v2934_v10  ;;  %v2938_v19 = vpack.c.bf16 %v92_v17, %v91_v16  ;;  %2967 = vmatprep.subr.bf16.mxu1 %v3012_v0  ;;  %v2940_v22 = vpack.c.bf16 %v110_v21, %v109_v20  ;;  %v126_v24 = vld [vmem:[%s4599_s3 + $0x128] sm:$0xf]  ;;  %v93_v25 = vld [vmem:[%s4599_s3 + $0x20] sm:$0xff]  ;;  %v111_v27 = vld [vmem:[%s4599_s3 + $0xb0] sm:$0xff]  ;;  %vm1189_vm14 = vcmask 261120   ;;  %vm1201_vm15 = vcmask 326656  }
   0x7   :  { %2937 = vmatprep.subr.bf16.mxu0 %v2936_v14  ;;  %v94_v26 = vld [vmem:[%s4599_s3 + $0x28] sm:$0xff]  ;;  %v112_v28 = vld [vmem:[%s4599_s3 + $0xb8] sm:$0xff]  ;;  %v2971_v29 = vpack.c.bf16 %v126_v24, %v125_v23  ;;  %vm2972_vm3 = vmpackc.low %vm172_vm1, %vm3015_vm2  ;;  %vm1213_vm2 = vcmask 392192  }
   0x8   :  { %v2942_v30 = vpack.c.bf16 %v94_v26, %v93_v25  ;;  %v2944_v31 = vpack.c.bf16 %v112_v28, %v111_v27  ;;  %v95_v32 = vld [vmem:[%s4599_s3 + $0x30] sm:$0xff]  ;;  %v96_v33 = vld [vmem:[%s4599_s3 + $0x38] sm:$0xff]  ;;  %v113_v34 = vld [vmem:[%s4599_s3 + $0xc0] sm:$0xff] }
   0x9   :  { %2969 = vmatpush3.bf16.msra.mxu1 %v2968_v18  ;;  %v114_v35 = vld [vmem:[%s4599_s3 + $0xc8] sm:$0xff]  ;;  %v52_v36 = vld [vmem:[%s4600_s0 + $0x10] sm:$0xff]  ;;  %v2946_v37 = vpack.c.bf16 %v96_v33, %v95_v32  ;;  %v496_v38 = vld [vmem:[%s4601_s5] sm:$0xf]  ;;  %s3022_s5 = smov 56  }
   0xa   :  { %2939 = vmatpush3.bf16.msra.mxu0 %v2938_v19  ;;  %2970 = vmatprep.subr.bf16.mxu1 %v3012_v0  ;;  %v2948_v39 = vpack.c.bf16 %v114_v35, %v113_v34  ;;  %v97_v40 = vld [vmem:[%s4599_s3 + $0x40] sm:$0xff]  ;;  %v98_v41 = vld [vmem:[%s4599_s3 + $0x48] sm:$0xff]  ;;  %v115_v42 = vld [vmem:[%s4599_s3 + $0xd0] sm:$0xff] }
   0xb   :  { %2941 = vmatprep.subr.bf16.mxu0 %v2940_v22  ;;  %v116_v43 = vld [vmem:[%s4599_s3 + $0xd8] sm:$0xff]  ;;  %v51_v44 = vld [vmem:[%s4600_s0 + $0x8] sm:$0xff]  ;;  %v2950_v46 = vpack.c.bf16 %v98_v41, %v97_v40  ;;  %v99_v48 = vld [vmem:[%s4599_s3 + $0x50] sm:$0xff] }
   0xc   :  { %v55_v45 = vld [vmem:[%s4600_s0 + $0x28] sm:$0xff]  ;;  %v2952_v47 = vpack.c.bf16 %v116_v43, %v115_v42  ;;  %v100_v49 = vld [vmem:[%s4599_s3 + $0x58] sm:$0xff]  ;;  %v117_v50 = vld [vmem:[%s4599_s3 + $0xe0] sm:$0xff]  ;;  %240 = vmatprep.mubr.f32.mxu0 %v51_v44 }
   0xd   :  { %2973 = vmatpush3.bf16.msk.msra.mxu1 %vm2972_vm3, %v2971_v29  ;;  %v118_v51 = vld [vmem:[%s4599_s3 + $0xe8] sm:$0xff]  ;;  %v58_v52 = vld [vmem:[%s4600_s0 + $0x40] sm:$0xff]  ;;  %v2954_v53 = vpack.c.bf16 %v100_v49, %v99_v48  ;;  %v119_v57 = vld [vmem:[%s4599_s3 + $0xf0] sm:$0xff]  ;;  %vm1225_vm3 = vcmask 457728  }
   0xe   :  { %2943 = vmatpush3.bf16.msra.mxu0 %v2942_v30  ;;  %2737 = vmatprep.subr.mxu1 %v3014_v8  ;;  %v2956_v54 = vpack.c.bf16 %v118_v51, %v117_v50  ;;  %v101_v55 = vld [vmem:[%s4599_s3 + $0x60] sm:$0xff]  ;;  %v102_v56 = vld [vmem:[%s4599_s3 + $0x68] sm:$0xff]  ;;  %v120_v58 = vld [vmem:[%s4599_s3 + $0xf8] sm:$0xff] }
   0xf   :  { %2945 = vmatprep.subr.bf16.mxu0 %v2944_v31  ;;  %v61_v59 = vld [vmem:[%s4600_s0 + $0x58] sm:$0xff]  ;;  %v2958_v60 = vpack.c.bf16 %v102_v56, %v101_v55  ;;  %v2960_v61 = vpack.c.bf16 %v120_v58, %v119_v57  ;;  %v103_v62 = vld [vmem:[%s4599_s3 + $0x70] sm:$0xff]  ;;  %v67_v3 = vld [vmem:[%s4600_s0 + $0x88] sm:$0xff]  ;;  %v128_v55 = vlaneseq }
  0x10   :  { %2699 = vmatmul.mubr.msk.f32.vlgmr.msra.gmra.mrb[0].mxu1 %vm132_vm4, %v52_v36  ;;  %v104_v63 = vld [vmem:[%s4599_s3 + $0x78] sm:$0xff]  ;;  %v64_v1 = vld [vmem:[%s4600_s0 + $0x70] sm:$0xff]  ;;  %v50_v4 = vld [vmem:[%s4600_s0] sm:$0xff]  ;;  %s3020_s3 = smov 32  }
  0x11   :  { %2738 = vmatpush3.msk.msra.mxu1 %vm172_vm1, %v496_v38  ;;  %2701 = vmatprep.mubr.msk.f32.mxu1 %vm3013_vm0, %v3014_v8  ;;  %v2962_v2 = vpack.c.bf16 %v104_v63, %v103_v62  ;;  %v54_v5 = vld [vmem:[%s4600_s0 + $0x20] sm:$0xff]  ;;  %v53_v7 = vld [vmem:[%s4600_s0 + $0x18] sm:$0xff]  ;;  %v56_v11 = vld [vmem:[%s4600_s0 + $0x30] sm:$0xff]  ;;  %v3474_v58 = vshrl.u32 %v128_v55, 7 }
  0x12   :  { %2947 = vmatpush3.bf16.msra.mxu0 %v2946_v37  ;;  %2989 = vmatprep.subr.mxu1 %v3014_v8  ;;  %v70_v6 = vld [vmem:[%s4600_s0 + $0xa0] sm:$0xff]  ;;  %v57_v9 = vld [vmem:[%s4600_s0 + $0x38] sm:$0xff]  ;;  %v60_v12 = vld [vmem:[%s4600_s0 + $0x50] sm:$0xff] }
  0x13   :  { %2949 = vmatprep.subr.bf16.mxu0 %v2948_v39  ;;  %v73_v10 = vld [vmem:[%s4600_s0 + $0xb8] sm:$0xff]  ;;  %v76_v13 = vld [vmem:[%s4600_s0 + $0xd0] sm:$0xff]  ;;  %v59_v14 = vld [vmem:[%s4600_s0 + $0x48] sm:$0xff] }
  0x14   :  { %2702 = vmatmul.mubr.msk.f32.gmra.mrb[2].mxu1 %vm132_vm4, %v55_v45  ;;  %v63_v15 = vld [vmem:[%s4600_s0 + $0x68] sm:$0xff]  ;;  %v62_v17 = vld [vmem:[%s4600_s0 + $0x60] sm:$0xff]  ;;  %v65_v20 = vld [vmem:[%s4600_s0 + $0x78] sm:$0xff] }
  0x15   :  { %2704 = vmatprep.mubr.msk.f32.mxu1 %vm3013_vm0, %v3014_v8  ;;  %v79_v16 = vld [vmem:[%s4600_s0 + $0xe8] sm:$0xff]  ;;  %v66_v18 = vld [vmem:[%s4600_s0 + $0x80] sm:$0xff]  ;;  %v69_v21 = vld [vmem:[%s4600_s0 + $0x98] sm:$0xff] }
  0x16   :  { %2951 = vmatpush3.bf16.msra.mxu0 %v2950_v46  ;;  %v82_v19 = vld [vmem:[%s4600_s0 + $0x100] sm:$0xff]  ;;  %v85_v22 = vld [vmem:[%s4600_s0 + $0x118] sm:$0xff]  ;;  %v68_v23 = vld [vmem:[%s4600_s0 + $0x90] sm:$0xff] }
  0x17   :  { %2953 = vmatprep.subr.bf16.mxu0 %v2952_v47  ;;  %v72_v24 = vld [vmem:[%s4600_s0 + $0xb0] sm:$0xff]  ;;  %v71_v26 = vld [vmem:[%s4600_s0 + $0xa8] sm:$0xff]  ;;  %v483_v28 = vld [vmem:[%s4602_s1] sm:$0xff] }
  0x18   :  { %2705 = vmatmul.mubr.msk.f32.gmra.mrb[4].mxu1 %vm132_vm4, %v58_v52  ;;  %v88_v25 = vld [vmem:[%s4600_s0 + $0x130] sm:$0xf]  ;;  %v75_v27 = vld [vmem:[%s4600_s0 + $0xc8] sm:$0xff]  ;;  %v74_v29 = vld [vmem:[%s4600_s0 + $0xc0] sm:$0xff] }
  0x19   :  { %2707 = vmatprep.mubr.msk.f32.mxu1 %vm3013_vm0, %v3014_v8  ;;  %v78_v30 = vld [vmem:[%s4600_s0 + $0xe0] sm:$0xff]  ;;  %v484_v31 = vld [vmem:[%s4602_s1 + $0x8] sm:$0xff]  ;;  %v77_v32 = vld [vmem:[%s4600_s0 + $0xd8] sm:$0xff] }
  0x1a   :  { %2955 = vmatpush3.bf16.msra.mxu0 %v2954_v53  ;;  %v81_v33 = vld [vmem:[%s4600_s0 + $0xf8] sm:$0xff]  ;;  %v485_v34 = vld [vmem:[%s4602_s1 + $0x10] sm:$0xff]  ;;  %v83_v38 = vld [vmem:[%s4600_s0 + $0x108] sm:$0xff] }
  0x1b   :  { %2957 = vmatprep.subr.bf16.mxu0 %v2956_v54  ;;  %v80_v35 = vld [vmem:[%s4600_s0 + $0xf0] sm:$0xff]  ;;  %v486_v37 = vld [vmem:[%s4602_s1 + $0x18] sm:$0xff]  ;;  %v87_v39 = vld [vmem:[%s4600_s0 + $0x128] sm:$0xf] }
  0x1c   :  { %2708 = vmatmul.mubr.msk.f32.gmra.mrb[6].mxu1 %vm132_vm4, %v61_v59  ;;  %v84_v36 = vld [vmem:[%s4600_s0 + $0x110] sm:$0xff]  ;;  %v487_v40 = vld [vmem:[%s4602_s1 + $0x20] sm:$0xff]  ;;  %v488_v42 = vld [vmem:[%s4602_s1 + $0x28] sm:$0xff] }
  0x1d   :  { %2710 = vmatprep.mubr.msk.f32.mxu1 %vm3013_vm0, %v3014_v8  ;;  %v86_v41 = vld [vmem:[%s4600_s0 + $0x120] sm:$0xf]  ;;  %v489_v43 = vld [vmem:[%s4602_s1 + $0x30] sm:$0xff]  ;;  %v490_v44 = vld [vmem:[%s4602_s1 + $0x38] sm:$0xff] }
  0x1e   :  { %2959 = vmatpush3.bf16.msra.mxu0 %v2958_v60  ;;  %v491_v45 = vld [vmem:[%s4602_s1 + $0x40] sm:$0xff]  ;;  %v492_v46 = vld [vmem:[%s4602_s1 + $0x48] sm:$0xff]  ;;  %v493_v47 = vld [vmem:[%s4602_s1 + $0x50] sm:$0xff] }
  0x1f   :  { %2961 = vmatprep.subr.bf16.mxu0 %v2960_v61  ;;  %v494_v48 = vld [vmem:[%s4602_s1 + $0x58] sm:$0xff]  ;;  %v495_v49 = vld [vmem:[%s4602_s1 + $0x60] sm:$0xf]  ;;  %v130_v61 = vsub.s32 0, %v3474_v58 }
  0x20   :  { %2711 = vmatmul.mubr.msk.f32.gmra.mrb[8].mxu1 %vm132_vm4, %v64_v1  ;;  %v3480_v63 = vld [vmem:[%s4603_s4] sm:$0x7] }
  0x21   :  { %2713 = vmatprep.mubr.msk.f32.mxu1 %vm3013_vm0, %v3014_v8 }
  0x22   :  { %2963 = vmatpush3.bf16.msra.mxu0 %v2962_v2 }
  0x23   :  { %2974 = vmatprep.subr.bf16.mxu0 %v3012_v0 }
  0x24   :  { %2714 = vmatmul.mubr.msk.f32.gmra.mrb[10].mxu1 %vm132_vm4, %v67_v3  ;;  %v3483_v3 = vrot.slane %v3480_v63, %v130_v61 }
  0x25   :  { %241 = vmatmul.mubr.f32.vlgmr.msra.gmra.mrb[0].mxu0 %v50_v4  ;;  %2716 = vmatprep.mubr.msk.f32.mxu1 %vm3013_vm0, %v3014_v8 }
  0x26   :  { %245 = vmatprep.mubr.f32.mxu0 %v54_v5 }
  0x28   :  { %2717 = vmatmul.mubr.msk.f32.gmra.mrb[12].mxu1 %vm132_vm4, %v70_v6 }
  0x29   :  { %246 = vmatmul.mubr.f32.gmra.mrb[2].mxu0 %v53_v7  ;;  %2719 = vmatprep.mubr.msk.f32.mxu1 %vm3013_vm0, %v3014_v8 }
  0x2a   :  { %250 = vmatprep.mubr.f32.mxu0 %v57_v9 }
  0x2c   :  { %2720 = vmatmul.mubr.msk.f32.gmra.mrb[14].mxu1 %vm132_vm4, %v73_v10 }
  0x2d   :  { %251 = vmatmul.mubr.f32.gmra.mrb[4].mxu0 %v56_v11  ;;  %2722 = vmatprep.mubr.msk.f32.mxu1 %vm3013_vm0, %v3014_v8 }
  0x2e   :  { %255 = vmatprep.mubr.f32.mxu0 %v60_v12 }
  0x30   :  { %2723 = vmatmul.mubr.msk.f32.gmra.mrb[16].mxu1 %vm132_vm4, %v76_v13 }
  0x31   :  { %256 = vmatmul.mubr.f32.gmra.mrb[6].mxu0 %v59_v14  ;;  %2725 = vmatprep.mubr.msk.f32.mxu1 %vm3013_vm0, %v3014_v8 }
  0x32   :  { %260 = vmatprep.mubr.f32.mxu0 %v63_v15 }
  0x34   :  { %2726 = vmatmul.mubr.msk.f32.gmra.mrb[18].mxu1 %vm132_vm4, %v79_v16 }
  0x35   :  { %261 = vmatmul.mubr.f32.gmra.mrb[8].mxu0 %v62_v17  ;;  %2728 = vmatprep.mubr.msk.f32.mxu1 %vm3013_vm0, %v3014_v8 }
  0x36   :  { %265 = vmatprep.mubr.f32.mxu0 %v66_v18 }
  0x38   :  { %2729 = vmatmul.mubr.msk.f32.gmra.mrb[20].mxu1 %vm132_vm4, %v82_v19 }
  0x39   :  { %266 = vmatmul.mubr.f32.gmra.mrb[10].mxu0 %v65_v20  ;;  %2731 = vmatprep.mubr.msk.f32.mxu1 %vm3013_vm0, %v3014_v8 }
  0x3a   :  { %270 = vmatprep.mubr.f32.mxu0 %v69_v21 }
  0x3c   :  { %2732 = vmatmul.mubr.msk.f32.gmra.mrb[22].mxu1 %vm132_vm4, %v85_v22 }
  0x3d   :  { %271 = vmatmul.mubr.f32.gmra.mrb[12].mxu0 %v68_v23  ;;  %2734 = vmatprep.mubr.msk.f32.mxu1 %vm3013_vm0, %v3014_v8 }
  0x3e   :  { %275 = vmatprep.mubr.f32.mxu0 %v72_v24 }
  0x40   :  { %2735 = vmatmul.mubr.msk.f32.gmra.mrb[24].mxu1 %vm132_vm4, %v88_v25  ;;  %vm1237_vm4 = vcmask 523264  }
  0x41   :  { %276 = vmatmul.mubr.f32.gmra.mrb[14].mxu0 %v71_v26  ;;  %2739 = vmatprep.mubr.msk.f32.mxu1 %vm3013_vm0, %v3014_v8 }
  0x42   :  { %280 = vmatprep.mubr.f32.mxu0 %v75_v27 }
  0x44   :  { %2740 = vmatmul.mubr.msk.f32.vlgmr.msra.gmra.mrb[26].mxu1 %vm4615_vm5, %v483_v28 }
  0x45   :  { %281 = vmatmul.mubr.f32.gmra.mrb[16].mxu0 %v74_v29  ;;  %2742 = vmatprep.mubr.msk.f32.mxu1 %vm3013_vm0, %v3014_v8 }
  0x46   :  { %285 = vmatprep.mubr.f32.mxu0 %v78_v30 }
  0x48   :  { %2743 = vmatmul.mubr.msk.f32.gmra.mrb[28].mxu1 %vm4615_vm5, %v484_v31 }
  0x49   :  { %286 = vmatmul.mubr.f32.gmra.mrb[18].mxu0 %v77_v32  ;;  %2745 = vmatprep.mubr.msk.f32.mxu1 %vm3013_vm0, %v3014_v8 }
  0x4a   :  { %290 = vmatprep.mubr.f32.mxu0 %v81_v33 }
  0x4c   :  { %2746 = vmatmul.mubr.msk.f32.gmra.mrb[30].mxu1 %vm4615_vm5, %v485_v34 }
  0x4d   :  { %291 = vmatmul.mubr.f32.gmra.mrb[20].mxu0 %v80_v35  ;;  %2748 = vmatprep.mubr.msk.f32.mxu1 %vm3013_vm0, %v3014_v8 }
  0x4e   :  { %295 = vmatprep.mubr.f32.mxu0 %v84_v36 }
  0x50   :  { %2749 = vmatmul.mubr.msk.f32.gmra.mrb[32].mxu1 %vm4615_vm5, %v486_v37 }
  0x51   :  { %296 = vmatmul.mubr.f32.gmra.mrb[22].mxu0 %v83_v38  ;;  %2751 = vmatprep.mubr.msk.f32.mxu1 %vm3013_vm0, %v3014_v8 }
  0x52   :  { %300 = vmatprep.mubr.f32.mxu0 %v87_v39 }
  0x54   :  { %2752 = vmatmul.mubr.msk.f32.gmra.mrb[34].mxu1 %vm4615_vm5, %v487_v40 }
  0x55   :  { %301 = vmatmul.mubr.f32.gmra.mrb[24].mxu0 %v86_v41  ;;  %2754 = vmatprep.mubr.msk.f32.mxu1 %vm3013_vm0, %v3014_v8 }
  0x56   :  { %2796 = vmatprep.mubr.msk.f32.mxu0 %vm3013_vm0, %v3014_v8 }
  0x58   :  { %2755 = vmatmul.mubr.msk.f32.gmra.mrb[36].mxu1 %vm4615_vm5, %v488_v42 }
  0x59   :  { %2757 = vmatprep.mubr.msk.f32.mxu1 %vm3013_vm0, %v3014_v8 }
  0x5c   :  { %2758 = vmatmul.mubr.msk.f32.gmra.mrb[38].mxu1 %vm4615_vm5, %v489_v43 }
  0x5d   :  { %2760 = vmatprep.mubr.msk.f32.mxu1 %vm3013_vm0, %v3014_v8 }
  0x60   :  { %2761 = vmatmul.mubr.msk.f32.gmra.mrb[40].mxu1 %vm4615_vm5, %v490_v44 }
  0x61   :  { %2763 = vmatprep.mubr.msk.f32.mxu1 %vm3013_vm0, %v3014_v8 }
  0x64   :  { %2764 = vmatmul.mubr.msk.f32.gmra.mrb[42].mxu1 %vm4615_vm5, %v491_v45 }
  0x65   :  { %2766 = vmatprep.mubr.msk.f32.mxu1 %vm3013_vm0, %v3014_v8 }
  0x68   :  { %2767 = vmatmul.mubr.msk.f32.gmra.mrb[44].mxu1 %vm4615_vm5, %v492_v46 }
  0x69   :  { %2769 = vmatprep.mubr.msk.f32.mxu1 %vm3013_vm0, %v3014_v8 }
  0x6c   :  { %2770 = vmatmul.mubr.msk.f32.gmra.mrb[46].mxu1 %vm4615_vm5, %v493_v47 }
  0x6d   :  { %2772 = vmatprep.mubr.msk.f32.mxu1 %vm3013_vm0, %v3014_v8 }
  0x70   :  { %2773 = vmatmul.mubr.msk.f32.gmra.mrb[48].mxu1 %vm4615_vm5, %v494_v48 }
  0x71   :  { %2775 = vmatprep.mubr.msk.f32.mxu1 %vm3013_vm0, %v3014_v8 }
  0x74   :  { %2776 = vmatmul.mubr.msk.f32.gmra.mrb[50].mxu1 %vm4615_vm5, %v495_v49  ;;  %vm1265_vm5 = vcmask 588800  }
  0x75   :  { %2840 = vmatprep.mubr.msk.f32.mxu1 %vm3013_vm0, %v3014_v8 }
  0xe3   :  { %v372_v50 = vpop.f32.mrb[0].mxu1 }
  0xe4   :  { %v2700_v51 = vpop.f32.mrb[1].mxu1 }
  0xe5   :  { %v451_v51 = vsub.s32 1, %v3474_v58 }
  0xe7   :  { %v377_v52 = vpop.f32.mrb[2].mxu1 }
  0xe8   :  { %v2703_v53 = vpop.f32.mrb[3].mxu1 }
  0xeb   :  { %v382_v54 = vpop.f32.mrb[4].mxu1 }
  0xec   :  { %v2706_v56 = vpop.f32.mrb[5].mxu1 }
  0xef   :  { %v387_v57 = vpop.f32.mrb[6].mxu1 }
  0xf0   :  { %v2709_v59 = vpop.f32.mrb[7].mxu1 }
  0xf1   :  { %v468_v59 = vsub.s32 2, %v3474_v58  ;;  %v1250_v58 = vld [vmem:[%s4605_s7 + $0x8] sm:$0xff] }
  0xf3   :  { %v392_v60 = vpop.f32.mrb[8].mxu1 }
  0xf4   :  { %v2712_v62 = vpop.f32.mrb[9].mxu1 }
  0xf7   :  { %v397_v1 = vpop.f32.mrb[10].mxu1 }
  0xf8   :  { %v2558_v2 = vpop.f32.mrb[0].mxu0  ;;  %v2715_v4 = vpop.f32.mrb[11].mxu1 }
  0xf9   :  { %v2559_v5 = vpop.f32.mrb[1].mxu0 }
  0xfa   :  { %v2560_v6 = vadd.f32 %v2559_v5, %v2558_v2  ;;  %v3525_v2 = vrot.slane %v3480_v63, %v451_v51 }
  0xfb   :  { %v402_v9 = vpop.f32.mrb[12].mxu1 }
  0xfc   :  { %v243_v7 = vadd.f32 %v2560_v6, %v3483_v3  ;;  %v2561_v10 = vpop.f32.mrb[2].mxu0  ;;  %v2718_v11 = vpop.f32.mrb[13].mxu1 }
  0xfd   :  { %v2562_v12 = vpop.f32.mrb[3].mxu0 }
  0xfe   :  { %v3486_v13 = vadd.f32 %v372_v50, %v243_v7  ;;  %v2563_v14 = vadd.f32 %v2562_v12, %v2561_v10  ;;  %v497_v50 = vld [vmem:[%s4604_s6] sm:$0x7]  ;;  %s3028_s6 = smov 12  }
  0xff   :  { %v3489_v16 = vpop.f32.mrb[14].mxu1  ;;  %v3537_v12 = vrot.slane %v497_v50, %v451_v51 }
 0x100   :  { %v248_v15 = vadd.f32 %v2563_v14, %v3483_v3  ;;  %v2564_v17 = vpop.f32.mrb[4].mxu0  ;;  %v2721_v18 = vpop.f32.mrb[15].mxu1 }
 0x101   :  { %v2565_v19 = vpop.f32.mrb[5].mxu0 }
 0x102   :  { %v3491_v20 = vadd.f32 %v377_v52, %v248_v15  ;;  %v2566_v21 = vadd.f32 %v2565_v19, %v2564_v17  ;;  %v3540_v17 = vrot.slane %v3480_v63, %v468_v59 }
 0x103   :  { %v3494_v23 = vpop.f32.mrb[16].mxu1 }
 0x104   :  { %v253_v22 = vadd.f32 %v2566_v21, %v3483_v3  ;;  %v2567_v24 = vpop.f32.mrb[6].mxu0  ;;  %v2724_v25 = vpop.f32.mrb[17].mxu1  ;;  %v437_v4 = vmax.f32 %v3491_v20, 0.0 }
 0x105   :  { %v2568_v26 = vpop.f32.mrb[7].mxu0  ;;  %v3546_v25 = vrot.slane %v497_v50, %v468_v59 }
 0x106   :  { %v3496_v27 = vadd.f32 %v382_v54, %v253_v22  ;;  %v2569_v28 = vadd.f32 %v2568_v26, %v2567_v24  ;;  %v454_v26 = vmul.f32 %v3525_v2, %v437_v4 }
 0x107   :  { %v3499_v30 = vpop.f32.mrb[18].mxu1 }
 0x108   :  { %v258_v29 = vadd.f32 %v2569_v28, %v3483_v3  ;;  %v2570_v31 = vpop.f32.mrb[8].mxu0  ;;  %v2727_v32 = vpop.f32.mrb[19].mxu1 }
 0x109   :  { %v2571_v33 = vpop.f32.mrb[9].mxu0 }
 0x10a   :  { %v3501_v34 = vadd.f32 %v387_v57, %v258_v29  ;;  %v2572_v35 = vadd.f32 %v2571_v33, %v2570_v31  ;;  %v3520_v57 = vrot.slane %v497_v50, %v130_v61  ;;  %v1249_v61 = vld [vmem:[%s4605_s7] sm:$0xff] }
 0x10b   :  { %v3504_v37 = vpop.f32.mrb[20].mxu1  ;;  %v2975_v15 = vpack.c.bf16 %v1250_v58, %v1249_v61  ;;  %v1251_v58 = vld [vmem:[%s4605_s7 + $0x10] sm:$0xff] }
 0x10c   :  { %v263_v36 = vadd.f32 %v2572_v35, %v3483_v3  ;;  %v2573_v38 = vpop.f32.mrb[10].mxu0  ;;  %v2730_v39 = vpop.f32.mrb[21].mxu1  ;;  %v439_v22 = vmax.f32 %v3501_v34, 0.0 }
 0x10d   :  { %v2574_v40 = vpop.f32.mrb[11].mxu0  ;;  %2976 = vmatpush3.bf16.msra.mxu0 %v2975_v15 }
 0x10e   :  { %v3506_v41 = vadd.f32 %v392_v60, %v263_v36  ;;  %v2575_v42 = vadd.f32 %v2574_v40, %v2573_v38  ;;  %2977 = vmatprep.subr.bf16.mxu0 %v3012_v0  ;;  %v456_v40 = vmul.f32 %v3525_v2, %v439_v22 }
 0x10f   :  { %v3509_v44 = vpop.f32.mrb[22].mxu1 }
 0x110   :  { %v268_v43 = vadd.f32 %v2575_v42, %v3483_v3  ;;  %v2576_v45 = vpop.f32.mrb[12].mxu0  ;;  %v2733_v46 = vpop.f32.mrb[23].mxu1 }
 0x111   :  { %v2577_v47 = vpop.f32.mrb[13].mxu0 }
 0x112   :  { %v3511_v48 = vadd.f32 %v397_v1, %v268_v43  ;;  %v2578_v49 = vadd.f32 %v2577_v47, %v2576_v45  ;;  %v436_v1 = vmax.f32 %v3486_v13, 0.0  ;;  %v471_v47 = vadd.f32 %v3540_v17, %v454_v26 }
 0x113   :  { %v3518_v53 = vpop.f32.mrb[24].mxu1 }
 0x114   :  { %v273_v52 = vadd.f32 %v2578_v49, %v3483_v3  ;;  %v2579_v54 = vpop.f32.mrb[14].mxu0  ;;  %v2736_v55 = vpop.f32.mrb[25].mxu1  ;;  %v453_v21 = vmul.f32 %v3525_v2, %v436_v1 }
 0x115   :  { %v2580_v56 = vpop.f32.mrb[15].mxu0 }
 0x116   :  { %v403_v60 = vadd.f32 %v402_v9, %v273_v52  ;;  %v2581_v62 = vadd.f32 %v2580_v56, %v2579_v54  ;;  %v438_v9 = vmax.f32 %v3496_v27, 0.0  ;;  %v470_v42 = vadd.f32 %v3540_v17, %v453_v21 }
 0x117   :  { %v611_v7 = vpop.f32.mrb[26].mxu1 }
 0x118   :  { %v442_v5 = vmax.f32 %v403_v60, 0.0  ;;  %v278_v6 = vadd.f32 %v2581_v62, %v3483_v3  ;;  %v2582_v10 = vpop.f32.mrb[16].mxu0  ;;  %v612_v11 = vadd.f32 %v611_v7, %v3520_v57  ;;  %v2741_v13 = vpop.f32.mrb[27].mxu1  ;;  %v440_v62 = vmax.f32 %v3506_v41, 0.0  ;;  %v1252_v41 = vld [vmem:[%s4605_s7 + $0x18] sm:$0xff] }
 0x119   :  { %v2583_v14 = vpop.f32.mrb[17].mxu0 }
 0x11a   :  { %v459_v18 = vmul.f32 %v3525_v2, %v442_v5  ;;  %v408_v19 = vadd.f32 %v3489_v16, %v278_v6  ;;  %v2584_v20 = vadd.f32 %v2583_v14, %v2582_v10  ;;  %v675_v24 = vmax.f32 %v612_v11, 0.0 }
 0x11b   :  { %v616_v63 = vpop.f32.mrb[28].mxu1  ;;  %v455_v16 = vmul.f32 %v3525_v2, %v438_v9  ;;  %v473_v10 = vadd.f32 %v3540_v17, %v456_v40 }
 0x11c   :  { %v443_v27 = vmax.f32 %v408_v19, 0.0  ;;  %v283_v28 = vadd.f32 %v2584_v20, %v3483_v3  ;;  %v2585_v29 = vpop.f32.mrb[18].mxu0  ;;  %v3551_v31 = vadd.f32 %v3540_v17, %v459_v18  ;;  %v692_v32 = vmul.f32 %v3537_v12, %v675_v24  ;;  %v2744_v34 = vpop.f32.mrb[29].mxu1 }
 0x11d   :  { %v617_v33 = vadd.f32 %v616_v63, %v3520_v57  ;;  %v2586_v35 = vpop.f32.mrb[19].mxu0  ;;  %v472_v55 = vadd.f32 %v3540_v17, %v455_v16  ;;  %v2978_v63 = vpack.c.bf16 %v1252_v41, %v1251_v58 }
 0x11e   :  { %v460_v36 = vmul.f32 %v3525_v2, %v443_v27  ;;  %v413_v38 = vadd.f32 %v3494_v23, %v283_v28  ;;  %v2587_v39 = vadd.f32 %v2586_v35, %v2585_v29  ;;  %v709_v43 = vadd.f32 %v3546_v25, %v692_v32 }
 0x11f   :  { %v676_v45 = vmax.f32 %v617_v33, 0.0  ;;  %v621_v50 = vpop.f32.mrb[30].mxu1  ;;  %2979 = vmatpush3.bf16.msra.mxu0 %v2978_v63 }
 0x120   :  { %v444_v46 = vmax.f32 %v413_v38, 0.0  ;;  %v288_v49 = vadd.f32 %v2587_v39, %v3483_v3  ;;  %v2588_v51 = vpop.f32.mrb[20].mxu0  ;;  %v3565_v52 = vadd.f32 %v3540_v17, %v460_v36  ;;  %v3567_v23 = vadd.f32 %v709_v43, %v470_v42  ;;  %v2747_v60 = vpop.f32.mrb[31].mxu1  ;;  %2980 = vmatprep.subr.bf16.mxu0 %v3012_v0 }
 0x121   :  { %v693_v54 = vmul.f32 %v3537_v12, %v676_v45  ;;  %v622_v56 = vadd.f32 %v621_v50, %v3520_v57  ;;  %v2589_v59 = vpop.f32.mrb[21].mxu0 }
 0x122   :  { %v461_v1 = vmul.f32 %v3525_v2, %v444_v46  ;;  %v418_v4 = vadd.f32 %v3499_v30, %v288_v49  ;;  %v2590_v5 = vadd.f32 %v2589_v59, %v2588_v51  ;;  %v747_v61 = vrot.slane %v3567_v23, 1 }
 0x123   :  { %v710_v6 = vadd.f32 %v3546_v25, %v693_v54  ;;  %v677_v7 = vmax.f32 %v622_v56, 0.0  ;;  %v626_v11 = vpop.f32.mrb[32].mxu1  ;;  %v858_v14 = vrot.slane %v3567_v23, 6  ;;  %v802_v15 = vrot.slane %v3567_v23, 2 }
 0x124   :  { %v445_v9 = vmax.f32 %v418_v4, 0.0  ;;  %v293_v30 = vadd.f32 %v2590_v5, %v3483_v3  ;;  %v2591_v13 = vpop.f32.mrb[22].mxu0  ;;  %v627_v20 = vadd.f32 %v626_v11, %v3520_v57  ;;  %v2750_v22 = vpop.f32.mrb[33].mxu1  ;;  %v3592_v24 = vadd.f32 %v3540_v17, %v461_v1 }
 0x125   :  { %v3587_v18 = vadd.f32 %v710_v6, %v471_v47  ;;  %v694_v19 = vmul.f32 %v3537_v12, %v677_v7  ;;  %v2592_v21 = vpop.f32.mrb[23].mxu0  ;;  %v441_v56 = vmax.f32 %v3511_v48, 0.0  ;;  %v915_v6 = vrot.slane %v3567_v23, 7 }
 0x126   :  { %v462_v26 = vmul.f32 %v3525_v2, %v445_v9  ;;  %v423_v27 = vadd.f32 %v3504_v37, %v293_v30  ;;  %v2593_v28 = vadd.f32 %v2592_v21, %v2591_v13  ;;  %v678_v16 = vmax.f32 %v627_v20, 0.0 }
 0x127   :  { %v711_v29 = vadd.f32 %v3546_v25, %v694_v19  ;;  %971 = vrot.lane.b32.xlu1 %v3587_v18, %s3016_s28  ;;  %v748_v32 = vrot.slane %v3587_v18, 1  ;;  %v859_v33 = vrot.slane %v3587_v18, 6  ;;  %v631_v36 = vpop.f32.mrb[34].mxu1  ;;  %v803_v37 = vrot.slane %v3587_v18, 2 }
 0x128   :  { %v446_v34 = vmax.f32 %v423_v27, 0.0  ;;  %v298_v35 = vadd.f32 %v2593_v28, %v3483_v3  ;;  %v2594_v38 = vpop.f32.mrb[24].mxu0  ;;  %v916_v39 = vrot.slane %v3587_v18, 7  ;;  %v695_v42 = vmul.f32 %v3537_v12, %v678_v16  ;;  %v2753_v47 = vpop.f32.mrb[35].mxu1 }
 0x129   :  { %v3604_v40 = vadd.f32 %v711_v29, %v472_v55  ;;  %v632_v43 = vadd.f32 %v631_v36, %v3520_v57  ;;  %v2595_v45 = vpop.f32.mrb[25].mxu0  ;;  %v749_v46 = vsel %vm746_vm6, %v747_v61, %v748_v32  ;;  %v860_v54 = vsel %vm857_vm7, %v858_v14, %v859_v33 }
 0x12a   :  { %v463_v49 = vmul.f32 %v3525_v2, %v446_v34  ;;  %v428_v50 = vadd.f32 %v3509_v44, %v298_v35  ;;  %v2596_v51 = vadd.f32 %v2595_v45, %v2594_v38  ;;  %768 = vrot.lane.b32.xlu0 %v749_v46, %s3017_s29  ;;  %v457_v55 = vmul.f32 %v3525_v2, %v440_v62 }
 0x12b   :  { %v712_v59 = vadd.f32 %v3546_v25, %v695_v42  ;;  %v679_v60 = vmax.f32 %v632_v43, 0.0  ;;  %881 = vrot.lane.b32.xlu1 %v860_v54, %s3018_s30  ;;  %v636_v4 = vpop.f32.mrb[36].mxu1  ;;  %v804_v5 = vsel %vm801_vm8, %v802_v15, %v803_v37  ;;  %v750_v58 = vrot.slane %v3604_v40, 1 }
 0x12c   :  { %v447_v1 = vmax.f32 %v428_v50, 0.0  ;;  %v303_v44 = vadd.f32 %v2596_v51, %v3483_v3  ;;  %v637_v62 = vadd.f32 %v636_v4, %v3520_v57  ;;  %v2756_v61 = vpop.f32.mrb[37].mxu1  ;;  %v917_v9 = vsel %vm914_vm9, %v915_v6, %v916_v39 }
 0x12d   :  { %v3625_v7 = vadd.f32 %v712_v59, %v473_v10  ;;  %v696_v48 = vmul.f32 %v3537_v12, %v679_v60  ;;  %v458_v10 = vmul.f32 %v3525_v2, %v441_v56  ;;  %v474_v30 = vadd.f32 %v3540_v17, %v457_v55 }
 0x12e   :  { %v464_v41 = vmul.f32 %v3525_v2, %v447_v1  ;;  %v433_v3 = vadd.f32 %v3518_v53, %v303_v44  ;;  %823 = vrot.lane.b32.xlu0 %v804_v5, %s3019_s16  ;;  %v680_v13 = vmax.f32 %v637_v62, 0.0  ;;  %v805_v53 = vrot.slane %v3604_v40, 2 }
 0x12f   :  { %v713_v11 = vadd.f32 %v3546_v25, %v696_v48  ;;  %938 = vrot.lane.b32.xlu1 %v917_v9, %s3020_s3  ;;  %v641_v15 = vpop.f32.mrb[38].mxu1  ;;  %v3642_v19 = vadd.f32 %v3540_v17, %v462_v26  ;;  %v751_v27 = vsel %vm746_vm6, %v748_v32, %v750_v58  ;;  %v1006_v29 = vrot.slane %v3604_v40, 4 }
 0x130   :  { %v448_v14 = vmax.f32 %v433_v3, 0.0  ;;  %v697_v21 = vmul.f32 %v3537_v12, %v680_v13  ;;  %v642_v22 = vadd.f32 %v641_v15, %v3520_v57  ;;  %v2759_v28 = vpop.f32.mrb[39].mxu1  ;;  %v475_v26 = vadd.f32 %v3540_v17, %v458_v10 }
 0x131   :  { %v3644_v20 = vadd.f32 %v713_v11, %v474_v30  ;;  %v3659_v35 = vadd.f32 %v3540_v17, %v463_v49  ;;  %v1005_v32 = vrot.slane %v3587_v18, 4  ;;  %v3664_v38 = vadd.f32 %v3540_v17, %v464_v41 }
 0x132   :  { %v465_v63 = vmul.f32 %v3525_v2, %v448_v14  ;;  %770 = vrot.lane.b32.xlu0 %v751_v27, %s3017_s29  ;;  %v714_v16 = vadd.f32 %v3546_v25, %v697_v21  ;;  %v681_v34 = vmax.f32 %v642_v22, 0.0  ;;  %v861_v2 = vrot.slane %v3604_v40, 6 }
 0x133   :  { %973 = vrot.lane.b32.xlu1 %v3604_v40, %s3016_s28  ;;  %v646_v36 = vpop.f32.mrb[40].mxu1  ;;  %v806_v46 = vsel %vm801_vm8, %v803_v37, %v805_v53  ;;  %v1007_v49 = vsel %vm172_vm1, %v1005_v32, %v1006_v29  ;;  %v1063_v50 = vrot.slane %v3604_v40, 5  ;;  %v1062_v59 = vrot.slane %v3587_v18, 5 }
 0x134   :  { %v3666_v42 = vadd.f32 %v714_v16, %v475_v26  ;;  %v698_v43 = vmul.f32 %v3537_v12, %v681_v34  ;;  %v647_v45 = vadd.f32 %v646_v36, %v3520_v57  ;;  %v2762_v47 = vpop.f32.mrb[41].mxu1  ;;  %v3681_v51 = vadd.f32 %v3540_v17, %v465_v63 }
 0x135   :  { %v862_v56 = vsel %vm857_vm7, %v859_v33, %v861_v2  ;;  %v918_v4 = vrot.slane %v3604_v40, 7  ;;  %v1064_v5 = vsel %vm1061_vm10, %v1062_v59, %v1063_v50  ;;  %v752_v48 = vrot.slane %v3625_v7, 1 }
 0x136   :  { %825 = vrot.lane.b32.xlu0 %v806_v46, %s3019_s16  ;;  %v715_v54 = vadd.f32 %v3546_v25, %v698_v43  ;;  %v682_v55 = vmax.f32 %v647_v45, 0.0  ;;  %v1008_v22 = vrot.slane %v3625_v7, 4  ;;  %v863_v36 = vrot.slane %v3625_v7, 6 }
 0x137   :  { %1028 = vrot.lane.b32.xlu1 %v1007_v49, %s3021_s17  ;;  %v651_v37 = vpop.f32.mrb[42].mxu1  ;;  %v919_v3 = vsel %vm914_vm9, %v916_v39, %v918_v4  ;;  %v753_v39 = vsel %vm746_vm6, %v750_v58, %v752_v48  ;;  %v1065_v43 = vrot.slane %v3625_v7, 5  ;;  %v920_v46 = vrot.slane %v3625_v7, 7 }
 0x138   :  { %v3692_v60 = vadd.f32 %v715_v54, %v3551_v31  ;;  %v699_v17 = vmul.f32 %v3537_v12, %v682_v55  ;;  %v652_v1 = vadd.f32 %v651_v37, %v3520_v57  ;;  %v2765_v44 = vpop.f32.mrb[43].mxu1  ;;  %v1009_v32 = vsel %vm172_vm1, %v1006_v29, %v1008_v22 }
 0x139   :  { %v864_v29 = vsel %vm857_vm7, %v861_v2, %v863_v36  ;;  %v1066_v37 = vsel %vm1061_vm10, %v1063_v50, %v1065_v43  ;;  %v754_v2 = vrot.slane %v3644_v20, 1  ;;  %v1254_v50 = vld [vmem:[%s4605_s7 + $0x28] sm:$0xff] }
 0x13a   :  { %883 = vrot.lane.b32.xlu0 %v862_v56, %s3018_s30  ;;  %v716_v33 = vadd.f32 %v3546_v25, %v699_v17  ;;  %v683_v6 = vmax.f32 %v652_v1, 0.0  ;;  %v921_v17 = vsel %vm914_vm9, %v918_v4, %v920_v46  ;;  %v1253_v1 = vld [vmem:[%s4605_s7 + $0x20] sm:$0xff] }
 0x13b   :  { %1085 = vrot.lane.b32.xlu1 %v1064_v5, %s3022_s5  ;;  %v656_v31 = vpop.f32.mrb[44].mxu1  ;;  %v2981_v4 = vpack.c.bf16 %v1254_v50, %v1253_v1  ;;  %v926_v1 = vrot.slane %v3692_v60, 7 }
 0x13c   :  { %v3705_v62 = vadd.f32 %v716_v33, %v3565_v52  ;;  %v700_v61 = vmul.f32 %v3537_v12, %v683_v6  ;;  %v657_v41 = vadd.f32 %v656_v31, %v3520_v57  ;;  %v2768_v9 = vpop.f32.mrb[45].mxu1  ;;  %v807_v52 = vrot.slane %v3625_v7, 2 }
 0x13d   :  { %v755_v33 = vsel %vm746_vm6, %v752_v48, %v754_v2  ;;  %v809_v6 = vrot.slane %v3644_v20, 2  ;;  %2982 = vmatpush3.bf16.msra.mxu0 %v2981_v4 }
 0x13e   :  { %940 = vrot.lane.b32.xlu0 %v919_v3, %s3020_s3  ;;  %v717_v10 = vadd.f32 %v3546_v25, %v700_v61  ;;  %v684_v30 = vmax.f32 %v657_v41, 0.0  ;;  %v808_v63 = vsel %vm801_vm8, %v805_v53, %v807_v52  ;;  %2983 = vmatprep.subr.bf16.mxu0 %v3012_v0  ;;  %v865_v41 = vrot.slane %v3644_v20, 6  ;;  %v1257_v3 = vld [vmem:[%s4605_s7 + $0x40] sm:$0xff] }
 0x13f   :  { %1120 = vrot.lane.b32.xlu1 %v862_v56, %s3023_s18  ;;  %v661_v11 = vpop.f32.mrb[46].mxu1  ;;  %v810_v61 = vsel %vm801_vm8, %v807_v52, %v809_v6  ;;  %v815_v4 = vrot.slane %v3705_v62, 2 }
 0x140   :  { %v3717_v13 = vadd.f32 %v717_v10, %v3592_v24  ;;  %v701_v14 = vmul.f32 %v3537_v12, %v684_v30  ;;  %v662_v15 = vadd.f32 %v661_v11, %v3520_v57  ;;  %v2771_v21 = vpop.f32.mrb[47].mxu1 }
 0x141   :  { %v922_v21 = vrot.slane %v3644_v20, 7 }
 0x142   :  { %772 = vrot.lane.b32.xlu0 %v753_v39, %s3017_s29  ;;  %v718_v27 = vadd.f32 %v3546_v25, %v701_v14  ;;  %v685_v28 = vmax.f32 %v662_v15, 0.0  ;;  %v866_v15 = vsel %vm857_vm7, %v863_v36, %v865_v41 }
 0x143   :  { %975 = vrot.lane.b32.xlu1 %v3625_v7, %s3016_s28  ;;  %v666_v24 = vpop.f32.mrb[48].mxu1 }
 0x144   :  { %v3733_v26 = vadd.f32 %v718_v27, %v3642_v19  ;;  %v702_v58 = vmul.f32 %v3537_v12, %v685_v28  ;;  %v667_v16 = vadd.f32 %v666_v24, %v3520_v57  ;;  %v2774_v34 = vpop.f32.mrb[49].mxu1  ;;  %v923_v24 = vsel %vm914_vm9, %v920_v46, %v922_v21 }
 0x145   :  { %v1012_v34 = vrot.slane %v3666_v42, 4 }
 0x146   :  { %827 = vrot.lane.b32.xlu0 %v808_v63, %s3019_s16  ;;  %v719_v53 = vadd.f32 %v3546_v25, %v702_v58  ;;  %v686_v45 = vmax.f32 %v667_v16, 0.0  ;;  %v756_v63 = vrot.slane %v3666_v42, 1  ;;  %v811_v16 = vrot.slane %v3666_v42, 2 }
 0x147   :  { %1030 = vrot.lane.b32.xlu1 %v1009_v32, %s3021_s17  ;;  %v671_v19 = vpop.f32.mrb[50].mxu1  ;;  %v867_v32 = vrot.slane %v3666_v42, 6 }
 0x148   :  { %v3747_v47 = vadd.f32 %v719_v53, %v3659_v35  ;;  %v703_v49 = vmul.f32 %v3537_v12, %v686_v45  ;;  %v672_v54 = vadd.f32 %v671_v19, %v3520_v57  ;;  %v2777_v55 = vpop.f32.mrb[51].mxu1  ;;  %v757_v58 = vsel %vm746_vm6, %v754_v2, %v756_v63 }
 0x149   :  { %v812_v36 = vsel %vm801_vm8, %v809_v6, %v811_v16  ;;  %v1069_v53 = vrot.slane %v3666_v42, 5  ;;  %v868_v45 = vsel %vm857_vm7, %v865_v41, %v867_v32  ;;  %v924_v19 = vrot.slane %v3666_v42, 7 }
 0x14a   :  { %885 = vrot.lane.b32.xlu0 %v864_v29, %s3018_s30  ;;  %v720_v56 = vadd.f32 %v3546_v25, %v703_v49  ;;  %v687_v59 = vmax.f32 %v672_v54, 0.0  ;;  %v758_v54 = vrot.slane %v3692_v60, 1  ;;  %v813_v55 = vrot.slane %v3692_v60, 2 }
 0x14b   :  { %1087 = vrot.lane.b32.xlu1 %v1066_v37, %s3022_s5  ;;  %v925_v49 = vsel %vm914_vm9, %v922_v21, %v924_v19  ;;  %v1014_v37 = vrot.slane %v3692_v60, 4  ;;  %v871_v6 = vrot.slane %v3705_v62, 6  ;;  %v928_v41 = vrot.slane %v3705_v62, 7 }
 0x14c   :  { %v3761_v35 = vadd.f32 %v720_v56, %v3664_v38  ;;  %v704_v57 = vmul.f32 %v3537_v12, %v687_v59  ;;  %v1255_v12 = vld [vmem:[%s4605_s7 + $0x30] sm:$0xff]  ;;  %v1256_v38 = vld [vmem:[%s4605_s7 + $0x38] sm:$0xff]  ;;  %v814_v56 = vsel %vm801_vm8, %v811_v16, %v813_v55  ;;  %v869_v59 = vrot.slane %v3692_v60, 6 }
 0x14d   :  { %v2984_v31 = vpack.c.bf16 %v1256_v38, %v1255_v12  ;;  %v760_v12 = vrot.slane %v3705_v62, 1  ;;  %v930_v16 = vrot.slane %v3717_v13, 7 }
 0x14e   :  { %942 = vrot.lane.b32.xlu0 %v921_v17, %s3020_s3  ;;  %v721_v44 = vadd.f32 %v3546_v25, %v704_v57  ;;  %v1010_v25 = vrot.slane %v3644_v20, 4  ;;  %v879_v9 = vrot.slane %v3761_v35, 6  ;;  %v1024_v10 = vrot.slane %v3761_v35, 4 }
 0x14f   :  { %1122 = vrot.lane.b32.xlu1 %v864_v29, %s3023_s18  ;;  %2985 = vmatpush3.bf16.msra.mxu0 %v2984_v31  ;;  %v1081_v30 = vrot.slane %v3761_v35, 5  ;;  %v759_v29 = vsel %vm746_vm6, %v756_v63, %v758_v54  ;;  %v1015_v57 = vsel %vm172_vm1, %v1012_v34, %v1014_v37  ;;  %v1071_v17 = vrot.slane %v3692_v60, 5 }
 0x150   :  { %v734_v5 = vadd.f32 %v721_v44, %v3681_v51  ;;  %v1067_v51 = vrot.slane %v3644_v20, 5  ;;  %v1011_v48 = vsel %vm172_vm1, %v1008_v22, %v1010_v25  ;;  %2794 = vmatprep.subr.mxu0 %v3014_v8  ;;  %v870_v2 = vsel %vm857_vm7, %v867_v32, %v869_v59 }
 0x151   :  { %v1072_v50 = vsel %vm1061_vm10, %v1069_v53, %v1071_v17  ;;  %v927_v44 = vsel %vm914_vm9, %v924_v19, %v926_v1  ;;  %v761_v38 = vsel %vm746_vm6, %v758_v54, %v760_v12  ;;  %v1073_v31 = vrot.slane %v3705_v62, 5 }
 0x152   :  { %774 = vrot.lane.b32.xlu0 %v755_v33, %s3017_s29  ;;  %v1026_v11 = vrot.slane %v734_v5, 4  ;;  %v1118_v52 = vrot.slane %v734_v5, 6  ;;  %v1083_v14 = vrot.slane %v734_v5, 5  ;;  %v1068_v39 = vsel %vm1061_vm10, %v1065_v43, %v1067_v51 }
 0x153   :  { %977 = vrot.lane.b32.xlu1 %v3644_v20, %s3016_s28  ;;  %2795 = vmatpush3.msra.mxu0 %v1257_v3  ;;  %v1013_v43 = vsel %vm172_vm1, %v1010_v25, %v1012_v34  ;;  %v1070_v46 = vsel %vm1061_vm10, %v1067_v51, %v1069_v53  ;;  %v1016_v5 = vrot.slane %v3705_v62, 4  ;;  %v816_v33 = vsel %vm801_vm8, %v813_v55, %v815_v4 }
 0x154   :  { %v3809_v22 = vsel %vm172_vm1, %v1024_v10, %v1026_v11  ;;  %v3814_v27 = vsel %vm857_vm7, %v879_v9, %v1118_v52  ;;  %v3819_v28 = vsel %vm1061_vm10, %v1081_v30, %v1083_v14  ;;  %2829 = vmatprep.subr.mxu0 %v3014_v8  ;;  %v1074_v51 = vsel %vm1061_vm10, %v1071_v17, %v1073_v31 }
 0x155   :  { %v1017_v25 = vsel %vm172_vm1, %v1014_v37, %v1016_v5  ;;  %v762_v3 = vrot.slane %v3717_v13, 1  ;;  %v817_v52 = vrot.slane %v3717_v13, 2  ;;  %v1018_v14 = vrot.slane %v3717_v13, 4 }
 0x156   :  { %829 = vrot.lane.b32.xlu0 %v810_v61, %s3019_s16  ;;  %v872_v61 = vsel %vm857_vm7, %v869_v59, %v871_v6  ;;  %v764_v53 = vrot.slane %v3733_v26, 1  ;;  %v1020_v54 = vrot.slane %v3733_v26, 4  ;;  %v875_v59 = vrot.slane %v3733_v26, 6 }
 0x157   :  { %1032 = vrot.lane.b32.xlu1 %v1011_v48, %s3021_s17  ;;  %v929_v48 = vsel %vm914_vm9, %v926_v1, %v928_v41  ;;  %v763_v11 = vsel %vm746_vm6, %v760_v12, %v762_v3  ;;  %v1019_v21 = vsel %vm172_vm1, %v1016_v5, %v1018_v14  ;;  %v932_v12 = vrot.slane %v3733_v26, 7 }
 0x158   :  { %v1021_v17 = vsel %vm172_vm1, %v1018_v14, %v1020_v54 }
 0x15a   :  { %887 = vrot.lane.b32.xlu0 %v866_v15, %s3018_s30 }
 0x15b   :  { %1089 = vrot.lane.b32.xlu1 %v1068_v39, %s3022_s5  ;;  %v873_v39 = vrot.slane %v3717_v13, 6 }
 0x15e   :  { %944 = vrot.lane.b32.xlu0 %v923_v24, %s3020_s3  ;;  %v1075_v24 = vrot.slane %v3717_v13, 5 }
 0x15f   :  { %1124 = vrot.lane.b32.xlu1 %v866_v15, %s3023_s18  ;;  %v818_v15 = vsel %vm801_vm8, %v815_v4, %v817_v52 }
 0x160   :  { %v1076_v34 = vsel %vm1061_vm10, %v1073_v31, %v1075_v24 }
 0x162   :  { %776 = vrot.lane.b32.xlu0 %v757_v58, %s3017_s29  ;;  %v874_v58 = vsel %vm857_vm7, %v871_v6, %v873_v39  ;;  %v933_v6 = vsel %vm914_vm9, %v930_v16, %v932_v12 }
 0x163   :  { %979 = vrot.lane.b32.xlu1 %v3666_v42, %s3016_s28 }
 0x166   :  { %831 = vrot.lane.b32.xlu0 %v812_v36, %s3019_s16 }
 0x167   :  { %1034 = vrot.lane.b32.xlu1 %v1013_v43, %s3021_s17  ;;  %v931_v43 = vsel %vm914_vm9, %v928_v41, %v930_v16  ;;  %v877_v16 = vrot.slane %v3747_v47, 6 }
 0x16a   :  { %889 = vrot.lane.b32.xlu0 %v868_v45, %s3018_s30 }
 0x16b   :  { %1091 = vrot.lane.b32.xlu1 %v1070_v46, %s3022_s5  ;;  %v765_v46 = vsel %vm746_vm6, %v762_v3, %v764_v53 }
 0x16e   :  { %946 = vrot.lane.b32.xlu0 %v925_v49, %s3020_s3  ;;  %v819_v49 = vrot.slane %v3733_v26, 2 }
 0x16f   :  { %1126 = vrot.lane.b32.xlu1 %v868_v45, %s3023_s18 }
 0x172   :  { %778 = vrot.lane.b32.xlu0 %v759_v29, %s3017_s29 }
 0x173   :  { %981 = vrot.lane.b32.xlu1 %v3692_v60, %s3016_s28 }
 0x176   :  { %833 = vrot.lane.b32.xlu0 %v814_v56, %s3019_s16  ;;  %v820_v56 = vsel %vm801_vm8, %v817_v52, %v819_v49 }
 0x177   :  { %1036 = vrot.lane.b32.xlu1 %v1015_v57, %s3021_s17 }
 0x17a   :  { %891 = vrot.lane.b32.xlu0 %v870_v2, %s3018_s30 }
 0x17b   :  { %1093 = vrot.lane.b32.xlu1 %v1072_v50, %s3022_s5 }
 0x17e   :  { %948 = vrot.lane.b32.xlu0 %v927_v44, %s3020_s3  ;;  %v876_v44 = vsel %vm857_vm7, %v873_v39, %v875_v59  ;;  %v1022_v39 = vrot.slane %v3747_v47, 4 }
 0x17f   :  { %1128 = vrot.lane.b32.xlu1 %v870_v2, %s3023_s18  ;;  %v1077_v2 = vrot.slane %v3733_v26, 5 }
 0x182   :  { %780 = vrot.lane.b32.xlu0 %v761_v38, %s3017_s29  ;;  %v1078_v38 = vsel %vm1061_vm10, %v1075_v24, %v1077_v2 }
 0x183   :  { %983 = vrot.lane.b32.xlu1 %v3705_v62, %s3016_s28 }
 0x186   :  { %835 = vrot.lane.b32.xlu0 %v816_v33, %s3019_s16 }
 0x187   :  { %1038 = vrot.lane.b32.xlu1 %v1017_v25, %s3021_s17 }
 0x18a   :  { %893 = vrot.lane.b32.xlu0 %v872_v61, %s3018_s30 }
 0x18b   :  { %1095 = vrot.lane.b32.xlu1 %v1074_v51, %s3022_s5 }
 0x18e   :  { %950 = vrot.lane.b32.xlu0 %v929_v48, %s3020_s3  ;;  %v766_v48 = vrot.slane %v3747_v47, 1 }
 0x18f   :  { %1130 = vrot.lane.b32.xlu1 %v872_v61, %s3023_s18 }
 0x190   :  { %v767_v14 = vsel %vm746_vm6, %v764_v53, %v766_v48 }
 0x192   :  { %782 = vrot.lane.b32.xlu0 %v763_v11, %s3017_s29 }
 0x193   :  { %985 = vrot.lane.b32.xlu1 %v3717_v13, %s3016_s28 }
 0x196   :  { %837 = vrot.lane.b32.xlu0 %v818_v15, %s3019_s16  ;;  %v821_v15 = vrot.slane %v3747_v47, 2 }
 0x197   :  { %1040 = vrot.lane.b32.xlu1 %v1019_v21, %s3021_s17 }
 0x199   :  { %v972_v63 = vpop.permute.xlu1 %971 }
 0x19a   :  { %895 = vrot.lane.b32.xlu0 %v874_v58, %s3018_s30 }
 0x19b   :  { %1097 = vrot.lane.b32.xlu1 %v1076_v34, %s3022_s5 }
 0x19c   :  { %v769_v36 = vpop.permute.xlu0 %768 }
 0x19d   :  { %v882_v32 = vpop.permute.xlu1 %881  ;;  %v1154_v55 = vsel %vm1153_vm11, %v3567_v23, %v769_v36  ;;  %v1023_v36 = vsel %vm172_vm1, %v1020_v54, %v1022_v39 }
 0x19e   :  { %952 = vrot.lane.b32.xlu0 %v931_v43, %s3020_s3 }
 0x19f   :  { %1132 = vrot.lane.b32.xlu1 %v874_v58, %s3023_s18  ;;  %v822_v58 = vsel %vm801_vm8, %v819_v49, %v821_v15 }
 0x1a0   :  { %v824_v45 = vpop.permute.xlu0 %823 }
 0x1a1   :  { %v939_v19 = vpop.permute.xlu1 %938  ;;  %v1166_v57 = vsel %vm1165_vm12, %v1154_v55, %v824_v45 }
 0x1a2   :  { %784 = vrot.lane.b32.xlu0 %v765_v46, %s3017_s29  ;;  %v1178_v23 = vsel %vm1177_vm13, %v1166_v57, %v882_v32  ;;  %v1079_v32 = vrot.slane %v3747_v47, 5  ;;  %v934_v46 = vrot.slane %v3747_v47, 7 }
 0x1a3   :  { %987 = vrot.lane.b32.xlu1 %v3733_v26, %s3016_s28  ;;  %v1190_v4 = vsel %vm1189_vm14, %v1178_v23, %v939_v19  ;;  %v878_v19 = vsel %vm857_vm7, %v875_v59, %v877_v16  ;;  %v936_v23 = vrot.slane %v3761_v35, 7 }
 0x1a4   :  { %v771_v29 = vpop.permute.xlu0 %770  ;;  %v1202_v25 = vsel %vm1201_vm15, %v1190_v4, %v972_v63  ;;  %v1080_v49 = vsel %vm1061_vm10, %v1077_v2, %v1079_v32 }
 0x1a5   :  { %v3919_v37 = vpop.permute.xlu1 %973  ;;  %v1155_v24 = vsel %vm1153_vm11, %v3587_v18, %v771_v29 }
 0x1a6   :  { %839 = vrot.lane.b32.xlu0 %v820_v56, %s3019_s16 }
 0x1a7   :  { %1042 = vrot.lane.b32.xlu1 %v1021_v17, %s3021_s17  ;;  %v935_v17 = vsel %vm914_vm9, %v932_v12, %v934_v46 }
 0x1a8   :  { %v826_v1 = vpop.permute.xlu0 %825 }
 0x1a9   :  { %v1029_v50 = vpop.permute.xlu1 %1028  ;;  %v1167_v34 = vsel %vm1165_vm12, %v1155_v24, %v826_v1  ;;  %v880_v1 = vsel %vm857_vm7, %v877_v16, %v879_v9 }
 0x1aa   :  { %897 = vrot.lane.b32.xlu0 %v876_v44, %s3018_s30  ;;  %v1214_v31 = vsel %vm1213_vm2, %v1202_v25, %v1029_v50 }
 0x1ab   :  { %1099 = vrot.lane.b32.xlu1 %v1078_v38, %s3022_s5  ;;  %v1025_v38 = vsel %vm172_vm1, %v1022_v39, %v1024_v10  ;;  %v1082_v10 = vsel %vm1061_vm10, %v1079_v32, %v1081_v30 }
 0x1ac   :  { %v884_v5 = vpop.permute.xlu0 %883 }
 0x1ad   :  { %v1086_v33 = vpop.permute.xlu1 %1085  ;;  %v1179_v43 = vsel %vm1177_vm13, %v1167_v34, %v884_v5  ;;  %v937_v5 = vsel %vm914_vm9, %v934_v46, %v936_v23 }
 0x1ae   :  { %954 = vrot.lane.b32.xlu0 %v933_v6, %s3020_s3  ;;  %v1226_v41 = vsel %vm1225_vm3, %v1214_v31, %v1086_v33 }
 0x1af   :  { %1134 = vrot.lane.b32.xlu1 %v876_v44, %s3023_s18 }
 0x1b0   :  { %v941_v61 = vpop.permute.xlu0 %940 }
 0x1b1   :  { %v1121_v51 = vpop.permute.xlu1 %1120  ;;  %v1191_v53 = vsel %vm1189_vm14, %v1179_v43, %v941_v61 }
 0x1b2   :  { %v1238_v3 = vsel %vm1237_vm4, %v1226_v41, %v1121_v51  ;;  %989 = vrot.lane.b32.xlu0 %v3747_v47, %s3016_s28  ;;  %v1203_v54 = vsel %vm1201_vm15, %v1191_v53, %v3919_v37 }
 0x1b3   :  { %788 = vrot.lane.b32.xlu1 %v766_v48, %s3017_s29  ;;  %2797 = vmatmul.mubr.msk.f32.vlgmr.msra.gmra.mrb[26].mxu0 %vm1265_vm5, %v1238_v3 }
 0x1b4   :  { %v773_v11 = vpop.permute.xlu0 %772  ;;  %2799 = vmatprep.mubr.msk.f32.mxu0 %vm3013_vm0, %v3014_v8 }
 0x1b5   :  { %v976_v52 = vpop.permute.xlu1 %975  ;;  %v1156_v44 = vsel %vm1153_vm11, %v3604_v40, %v773_v11  ;;  %v1430_v40 = vld [vmem:[%s4606_s9] sm:$0xff] }
 0x1b6   :  { %786 = vrot.lane.b32.xlu0 %v767_v14, %s3017_s29  ;;  %2830 = vmatpush3.msra.mxu0 %v1430_v40 }
 0x1b7   :  { %843 = vrot.lane.b32.xlu1 %v821_v15, %s3019_s16  ;;  %2990 = vmatpush3.msra.mxu1 %v1430_v40 }
 0x1b8   :  { %v828_v21 = vpop.permute.xlu0 %827  ;;  %2864 = vmatprep.subr.mxu0 %v3014_v8  ;;  %2986 = vmatprep.subr.bf16.mxu1 %v3012_v0 }
 0x1b9   :  { %v1031_v63 = vpop.permute.xlu1 %1030  ;;  %v1168_v4 = vsel %vm1165_vm12, %v1156_v44, %v828_v21 }
 0x1ba   :  { %841 = vrot.lane.b32.xlu0 %v822_v58, %s3019_s16  ;;  %v1215_v29 = vsel %vm1213_vm2, %v1203_v54, %v1031_v63 }
 0x1bb   :  { %1044 = vrot.lane.b32.xlu1 %v1023_v36, %s3021_s17 }
 0x1bc   :  { %v886_v18 = vpop.permute.xlu0 %885 }
 0x1bd   :  { %v1088_v45 = vpop.permute.xlu1 %1087  ;;  %v1180_v9 = vsel %vm1177_vm13, %v1168_v4, %v886_v18 }
 0x1be   :  { %899 = vrot.lane.b32.xlu0 %v878_v19, %s3018_s30  ;;  %v1227_v56 = vsel %vm1225_vm3, %v1215_v29, %v1088_v45 }
 0x1bf   :  { %1101 = vrot.lane.b32.xlu1 %v1080_v49, %s3022_s5 }
 0x1c0   :  { %v943_v55 = vpop.permute.xlu0 %942 }
 0x1c1   :  { %v1123_v57 = vpop.permute.xlu1 %1122  ;;  %v1192_v33 = vsel %vm1189_vm14, %v1180_v9, %v943_v55 }
 0x1c2   :  { %v1239_v59 = vsel %vm1237_vm4, %v1227_v56, %v1123_v57  ;;  %956 = vrot.lane.b32.xlu0 %v935_v17, %s3020_s3  ;;  %v1204_v31 = vsel %vm1201_vm15, %v1192_v33, %v976_v52 }
 0x1c3   :  { %1136 = vrot.lane.b32.xlu1 %v878_v19, %s3023_s18  ;;  %2800 = vmatmul.mubr.msk.f32.gmra.mrb[28].mxu0 %vm1265_vm5, %v1239_v59 }
 0x1c4   :  { %v775_v2 = vpop.permute.xlu0 %774  ;;  %2802 = vmatprep.mubr.msk.f32.mxu0 %vm3013_vm0, %v3014_v8 }
 0x1c5   :  { %v978_v37 = vpop.permute.xlu1 %977  ;;  %v1157_v3 = vsel %vm1153_vm11, %v3625_v7, %v775_v2 }
 0x1c6   :  { %991 = vrot.lane.b32.xlu0 %v3761_v35, %s3016_s28 }
 0x1c7   :  { %901 = vrot.lane.b32.xlu1 %v880_v1, %s3018_s30 }
 0x1c8   :  { %v830_v50 = vpop.permute.xlu0 %829 }
 0x1c9   :  { %v1033_v12 = vpop.permute.xlu1 %1032  ;;  %v1169_v52 = vsel %vm1165_vm12, %v1157_v3, %v830_v50 }
 0x1ca   :  { %1046 = vrot.lane.b32.xlu0 %v1025_v38, %s3021_s17  ;;  %v1216_v61 = vsel %vm1213_vm2, %v1204_v31, %v1033_v12 }
 0x1cb   :  { %958 = vrot.lane.b32.xlu1 %v937_v5, %s3020_s3  ;;  %s3024_s3 = smov 10  }
 0x1cc   :  { %v888_v6 = vpop.permute.xlu0 %887 }
 0x1cd   :  { %v1090_v25 = vpop.permute.xlu1 %1089  ;;  %v1181_v14 = vsel %vm1177_vm13, %v1169_v52, %v888_v6 }
 0x1ce   :  { %1103 = vrot.lane.b32.xlu0 %v1082_v10, %s3022_s5  ;;  %v1228_v35 = vsel %vm1225_vm3, %v1216_v61, %v1090_v25 }
 0x1cf   :  { %1048 = vrot.lane.b32.xlu1 %v3809_v22, %s3021_s17  ;;  %s3026_s17 = smov 4  }
 0x1d0   :  { %v945_v41 = vpop.permute.xlu0 %944 }
 0x1d1   :  { %v1125_v51 = vpop.permute.xlu1 %1124 }
 0x1d2   :  { %v1240_v30 = vsel %vm1237_vm4, %v1228_v35, %v1125_v51  ;;  %1138 = vrot.lane.b32.xlu0 %v880_v1, %s3023_s18 }
 0x1d3   :  { %1140 = vrot.lane.b32.xlu1 %v3814_v27, %s3023_s18  ;;  %2803 = vmatmul.mubr.msk.f32.gmra.mrb[30].mxu0 %vm1265_vm5, %v1240_v30  ;;  %v1193_v27 = vsel %vm1189_vm14, %v1181_v14, %v945_v41 }
 0x1d4   :  { %v777_v48 = vpop.permute.xlu0 %776  ;;  %2805 = vmatprep.mubr.msk.f32.mxu0 %vm3013_vm0, %v3014_v8  ;;  %v1205_v21 = vsel %vm1201_vm15, %v1193_v27, %v978_v37 }
 0x1d5   :  { %v980_v0 = vpop.permute.xlu1 %979  ;;  %v1158_v32 = vsel %vm1153_vm11, %v3644_v20, %v777_v48 }
 0x1d6   :  { %1105 = vrot.lane.b32.xlu0 %v3819_v28, %s3022_s5  ;;  %s3027_s5 = smov 6  }
 0x1d8   :  { %v832_v22 = vpop.permute.xlu0 %831 }
 0x1d9   :  { %v1035_v11 = vpop.permute.xlu1 %1034  ;;  %v1170_v53 = vsel %vm1165_vm12, %v1158_v32, %v832_v22 }
 0x1da   :  { %v1217_v24 = vsel %vm1213_vm2, %v1205_v21, %v1035_v11 }
 0x1dc   :  { %v890_v15 = vpop.permute.xlu0 %889 }
 0x1dd   :  { %v1092_v39 = vpop.permute.xlu1 %1091  ;;  %v1182_v18 = vsel %vm1177_vm13, %v1170_v53, %v890_v15 }
 0x1de   :  { %v1229_v28 = vsel %vm1225_vm3, %v1217_v24, %v1092_v39 }
 0x1e0   :  { %v947_v63 = vpop.permute.xlu0 %946 }
 0x1e1   :  { %v1127_v58 = vpop.permute.xlu1 %1126  ;;  %v1194_v45 = vsel %vm1189_vm14, %v1182_v18, %v947_v63 }
 0x1e2   :  { %v1241_v16 = vsel %vm1237_vm4, %v1229_v28, %v1127_v58  ;;  %v1206_v49 = vsel %vm1201_vm15, %v1194_v45, %v980_v0 }
 0x1e3   :  { %2806 = vmatmul.mubr.msk.f32.gmra.mrb[32].mxu0 %vm1265_vm5, %v1241_v16 }
 0x1e4   :  { %v779_v7 = vpop.permute.xlu0 %778  ;;  %2808 = vmatprep.mubr.msk.f32.mxu0 %vm3013_vm0, %v3014_v8 }
 0x1e5   :  { %v982_v34 = vpop.permute.xlu1 %981  ;;  %v1159_v2 = vsel %vm1153_vm11, %v3666_v42, %v779_v7 }
 0x1e8   :  { %v834_v36 = vpop.permute.xlu0 %833 }
 0x1e9   :  { %v1037_v43 = vpop.permute.xlu1 %1036  ;;  %v1171_v1 = vsel %vm1165_vm12, %v1159_v2, %v834_v36 }
 0x1ea   :  { %v1218_v54 = vsel %vm1213_vm2, %v1206_v49, %v1037_v43 }
 0x1ec   :  { %v892_v19 = vpop.permute.xlu0 %891 }
 0x1ed   :  { %v1094_v46 = vpop.permute.xlu1 %1093  ;;  %v1183_v23 = vsel %vm1177_vm13, %v1171_v1, %v892_v19 }
 0x1ee   :  { %v1230_v55 = vsel %vm1225_vm3, %v1218_v54, %v1094_v46 }
 0x1f0   :  { %v949_v29 = vpop.permute.xlu0 %948 }
 0x1f1   :  { %v1129_v56 = vpop.permute.xlu1 %1128  ;;  %v1195_v50 = vsel %vm1189_vm14, %v1183_v23, %v949_v29 }
 0x1f2   :  { %v1242_v57 = vsel %vm1237_vm4, %v1230_v55, %v1129_v56  ;;  %v1207_v38 = vsel %vm1201_vm15, %v1195_v50, %v982_v34 }
 0x1f3   :  { %2809 = vmatmul.mubr.msk.f32.gmra.mrb[34].mxu0 %vm1265_vm5, %v1242_v57 }
 0x1f4   :  { %v781_v20 = vpop.permute.xlu0 %780  ;;  %2811 = vmatprep.mubr.msk.f32.mxu0 %vm3013_vm0, %v3014_v8 }
 0x1f5   :  { %v984_v17 = vpop.permute.xlu1 %983  ;;  %v1160_v10 = vsel %vm1153_vm11, %v3692_v60, %v781_v20 }
 0x1f8   :  { %v836_v59 = vpop.permute.xlu0 %835 }
 0x1f9   :  { %v1039_v37 = vpop.permute.xlu1 %1038  ;;  %v1172_v61 = vsel %vm1165_vm12, %v1160_v10, %v836_v59 }
 0x1fa   :  { %v1219_v4 = vsel %vm1213_vm2, %v1207_v38, %v1039_v37 }
 0x1fc   :  { %v894_v44 = vpop.permute.xlu0 %893 }
 0x1fd   :  { %v1096_v12 = vpop.permute.xlu1 %1095  ;;  %v1184_v41 = vsel %vm1177_vm13, %v1172_v61, %v894_v44 }
 0x1fe   :  { %v1231_v9 = vsel %vm1225_vm3, %v1219_v4, %v1096_v12 }
 0x200   :  { %v951_v5 = vpop.permute.xlu0 %950 }
 0x201   :  { %v1131_v33 = vpop.permute.xlu1 %1130  ;;  %v1196_v35 = vsel %vm1189_vm14, %v1184_v41, %v951_v5 }
 0x202   :  { %v1243_v6 = vsel %vm1237_vm4, %v1231_v9, %v1131_v33  ;;  %v1208_v48 = vsel %vm1201_vm15, %v1196_v35, %v984_v17 }
 0x203   :  { %2812 = vmatmul.mubr.msk.f32.gmra.mrb[36].mxu0 %vm1265_vm5, %v1243_v6 }
 0x204   :  { %v783_v42 = vpop.permute.xlu0 %782  ;;  %2814 = vmatprep.mubr.msk.f32.mxu0 %vm3013_vm0, %v3014_v8 }
 0x205   :  { %v986_v40 = vpop.permute.xlu1 %985  ;;  %v1161_v15 = vsel %vm1153_vm11, %v3705_v62, %v783_v42 }
 0x208   :  { %v838_v25 = vpop.permute.xlu0 %837 }
 0x209   :  { %v1041_v31 = vpop.permute.xlu1 %1040  ;;  %v1173_v21 = vsel %vm1165_vm12, %v1161_v15, %v838_v25 }
 0x20a   :  { %v1220_v0 = vsel %vm1213_vm2, %v1208_v48, %v1041_v31 }
 0x20c   :  { %v896_v51 = vpop.permute.xlu0 %895 }
 0x20d   :  { %v1098_v30 = vpop.permute.xlu1 %1097  ;;  %v1185_v24 = vsel %vm1177_vm13, %v1173_v21, %v896_v51 }
 0x20e   :  { %v1232_v3 = vsel %vm1225_vm3, %v1220_v0, %v1098_v30 }
 0x210   :  { %v953_v22 = vpop.permute.xlu0 %952 }
 0x211   :  { %v1133_v11 = vpop.permute.xlu1 %1132  ;;  %v1197_v63 = vsel %vm1189_vm14, %v1185_v24, %v953_v22  ;;  %v4121_v22 = vld [vmem:[%s4607_s8] ss:$0 sm:$0xff] }
 0x212   :  { %v1244_v52 = vsel %vm1237_vm4, %v1232_v3, %v1133_v11  ;;  %v1209_v16 = vsel %vm1201_vm15, %v1197_v63, %v986_v40 }
 0x213   :  { %2815 = vmatmul.mubr.msk.f32.gmra.mrb[38].mxu0 %vm1265_vm5, %v1244_v52 }
 0x214   :  { %v785_v60 = vpop.permute.xlu0 %784  ;;  %2817 = vmatprep.mubr.msk.f32.mxu0 %vm3013_vm0, %v3014_v8 }
 0x215   :  { %v988_v14 = vpop.permute.xlu1 %987  ;;  %v1162_v46 = vsel %vm1153_vm11, %v3717_v13, %v785_v60 }
 0x218   :  { %v840_v27 = vpop.permute.xlu0 %839 }
 0x219   :  { %v1043_v39 = vpop.permute.xlu1 %1042  ;;  %v1174_v54 = vsel %vm1165_vm12, %v1162_v46, %v840_v27  ;;  %v1602_v46 = vld [vmem:[%s4608_s11] sm:$0xf] }
 0x21a   :  { %v1221_v7 = vsel %vm1213_vm2, %v1209_v16, %v1043_v39 }
 0x21c   :  { %v898_v28 = vpop.permute.xlu0 %897 }
 0x21d   :  { %v1100_v58 = vpop.permute.xlu1 %1099  ;;  %v1186_v29 = vsel %vm1177_vm13, %v1174_v54, %v898_v28 }
 0x21e   :  { %v1233_v36 = vsel %vm1225_vm3, %v1221_v7, %v1100_v58 }
 0x220   :  { %v955_v34 = vpop.permute.xlu0 %954 }
 0x221   :  { %v1135_v32 = vpop.permute.xlu1 %1134  ;;  %v1198_v55 = vsel %vm1189_vm14, %v1186_v29, %v955_v34 }
 0x222   :  { %v1245_v43 = vsel %vm1237_vm4, %v1233_v36, %v1135_v32  ;;  %v1210_v20 = vsel %vm1201_vm15, %v1198_v55, %v988_v14 }
 0x223   :  { %2818 = vmatmul.mubr.msk.f32.gmra.mrb[40].mxu0 %vm1265_vm5, %v1245_v43 }
 0x224   :  { %v990_v62 = vpop.permute.xlu0 %989  ;;  %2820 = vmatprep.mubr.msk.f32.mxu0 %vm3013_vm0, %v3014_v8 }
 0x225   :  { %v789_v53 = vpop.permute.xlu1 %788 }
 0x226   :  { %v1164_v33 = vsel %vm1153_vm11, %v3747_v47, %v789_v53 }
 0x228   :  { %v787_v18 = vpop.permute.xlu0 %786 }
 0x229   :  { %v844_v45 = vpop.permute.xlu1 %843  ;;  %v1163_v50 = vsel %vm1153_vm11, %v3733_v26, %v787_v18 }
 0x22a   :  { %v1176_v6 = vsel %vm1165_vm12, %v1164_v33, %v844_v45 }
 0x22c   :  { %v842_v19 = vpop.permute.xlu0 %841 }
 0x22d   :  { %v1045_v49 = vpop.permute.xlu1 %1044  ;;  %v1175_v12 = vsel %vm1165_vm12, %v1163_v50, %v842_v19 }
 0x22e   :  { %v1222_v17 = vsel %vm1213_vm2, %v1210_v20, %v1045_v49 }
 0x230   :  { %v900_v56 = vpop.permute.xlu0 %899 }
 0x231   :  { %v1102_v57 = vpop.permute.xlu1 %1101  ;;  %v1187_v4 = vsel %vm1177_vm13, %v1175_v12, %v900_v56 }
 0x232   :  { %v1234_v2 = vsel %vm1225_vm3, %v1222_v17, %v1102_v57 }
 0x234   :  { %v957_v59 = vpop.permute.xlu0 %956 }
 0x235   :  { %v1137_v37 = vpop.permute.xlu1 %1136  ;;  %v1199_v5 = vsel %vm1189_vm14, %v1187_v4, %v957_v59 }
 0x236   :  { %v1246_v1 = vsel %vm1237_vm4, %v1234_v2, %v1137_v37  ;;  %v1211_v42 = vsel %vm1201_vm15, %v1199_v5, %v990_v62 }
 0x237   :  { %2821 = vmatmul.mubr.msk.f32.gmra.mrb[42].mxu0 %vm1265_vm5, %v1246_v1 }
 0x238   :  { %v992_v13 = vpop.permute.xlu0 %991  ;;  %2823 = vmatprep.mubr.msk.f32.mxu0 %vm3013_vm0, %v3014_v8 }
 0x239   :  { %v902_v23 = vpop.permute.xlu1 %901 }
 0x23a   :  { %v1188_v40 = vsel %vm1177_vm13, %v1176_v6, %v902_v23 }
 0x23c   :  { %v1047_v44 = vpop.permute.xlu0 %1046 }
 0x23d   :  { %v959_v38 = vpop.permute.xlu1 %958  ;;  %v1223_v26 = vsel %vm1213_vm2, %v1211_v42, %v1047_v44 }
 0x23e   :  { %v1200_v10 = vsel %vm1189_vm14, %v1188_v40, %v959_v38 }
 0x23f   :  { %v1212_v47 = vsel %vm1201_vm15, %v1200_v10, %v992_v13 }
 0x240   :  { %v1104_v9 = vpop.permute.xlu0 %1103 }
 0x241   :  { %v1049_v25 = vpop.permute.xlu1 %1048  ;;  %v1235_v31 = vsel %vm1225_vm3, %v1223_v26, %v1104_v9  ;;  %v2490_v9 = vld [vmem:[%s4609_s10] ss:$0 sm:$0xff] }
 0x242   :  { %v1224_v35 = vsel %vm1213_vm2, %v1212_v47, %v1049_v25 }
 0x244   :  { %v1139_v61 = vpop.permute.xlu0 %1138 }
 0x245   :  { %v1247_v41 = vsel %vm1237_vm4, %v1235_v31, %v1139_v61  ;;  %v1141_v30 = vpop.permute.xlu1 %1140 }
 0x246   :  { %2824 = vmatmul.mubr.msk.f32.gmra.mrb[44].mxu0 %vm1265_vm5, %v1247_v41 }
 0x247   :  { %2826 = vmatprep.mubr.msk.f32.mxu0 %vm3013_vm0, %v3014_v8 }
 0x248   :  { %v1106_v51 = vpop.permute.xlu0 %1105 }
 0x249   :  { %v1236_v48 = vsel %vm1225_vm3, %v1224_v35, %v1106_v51 }
 0x24a   :  { %v1248_v0 = vsel %vm1237_vm4, %v1236_v48, %v1141_v30 }
 0x24b   :  { %2827 = vmatmul.mubr.msk.f32.gmra.mrb[46].mxu0 %vm1265_vm5, %v1248_v0  ;;  %vm4616_vm5 = vcmask 31744  }
 0x24c   :  { %2831 = vmatprep.mubr.msk.f32.mxu0 %vm3013_vm0, %v3014_v8  ;;  %vm4617_vm13 = vmmov %vm4616_vm5 }
 0x24d   :  { %vm4618_vm14 = vmmov %vm4616_vm5 }
 0x24e   :  { %vm4619_vm15 = vmmov %vm4616_vm5 }
 0x24f   :  { %vm4620_vm2 = vmmov %vm4616_vm5 }
 0x250   :  { %vm4621_vm3 = vmmov %vm4620_vm2 }
 0x251   :  { %vm4622_vm4 = vmmov %vm4620_vm2 }
 0x286   :  { %v1365_v3 = vpop.f32.mrb[26].mxu0 }
 0x287   :  { %v1366_v11 = vadd.f32 %v4121_v22, %v1365_v3  ;;  %v2798_v52 = vpop.f32.mrb[27].mxu0 }
 0x289   :  { %v1419_v60 = vmax.f32 %v1366_v11, 0.0 }
 0x28b   :  { %2832 = vmatmul.mubr.msk.f32.vlgmr.msra.gmra.mrb[48].mxu0 %vm1153_vm11, %v1419_v60 }
 0x28c   :  { %2834 = vmatprep.mubr.msk.f32.mxu0 %vm3013_vm0, %v3014_v8  ;;  %2865 = vmatpush3.msk.msra.mxu0 %vm172_vm1, %v1602_v46 }
 0x296   :  { %v1370_v14 = vpop.f32.mrb[28].mxu0 }
 0x297   :  { %v1371_v27 = vadd.f32 %v4121_v22, %v1370_v14  ;;  %v2801_v15 = vpop.f32.mrb[29].mxu0 }
 0x299   :  { %v1420_v39 = vmax.f32 %v1371_v27, 0.0 }
 0x29b   :  { %2835 = vmatmul.mubr.msk.f32.gmra.mrb[50].mxu0 %vm1153_vm11, %v1420_v39 }
 0x29c   :  { %2837 = vmatprep.mubr.msk.f32.mxu0 %vm3013_vm0, %v3014_v8 }
 0x2a6   :  { %v1375_v21 = vpop.f32.mrb[30].mxu0 }
 0x2a7   :  { %v1376_v24 = vadd.f32 %v4121_v22, %v1375_v21  ;;  %v2804_v63 = vpop.f32.mrb[31].mxu0 }
 0x2a9   :  { %v1421_v28 = vmax.f32 %v1376_v24, 0.0 }
 0x2ab   :  { %2838 = vmatmul.mubr.msk.f32.gmra.mrb[52].mxu0 %vm1153_vm11, %v1421_v28 }
 0x2ac   :  { %2866 = vmatprep.mubr.msk.f32.mxu0 %vm3013_vm0, %v3014_v8 }
 0x2b6   :  { %v1380_v58 = vpop.f32.mrb[32].mxu0 }
 0x2b7   :  { %v1381_v16 = vadd.f32 %v4121_v22, %v1380_v58  ;;  %v2807_v7 = vpop.f32.mrb[33].mxu0 }
 0x2b9   :  { %v1422_v34 = vmax.f32 %v1381_v16, 0.0 }
 0x2bb   :  { %2841 = vmatmul.mubr.msk.f32.vlgmr.msra.gmra.mrb[52].mxu1 %vm1153_vm11, %v1422_v34 }
 0x2bc   :  { %2843 = vmatprep.mubr.msk.f32.mxu1 %vm3013_vm0, %v3014_v8 }
 0x2c6   :  { %v1385_v36 = vpop.f32.mrb[34].mxu0 }
 0x2c7   :  { %v1386_v32 = vadd.f32 %v4121_v22, %v1385_v36  ;;  %v2810_v43 = vpop.f32.mrb[35].mxu0 }
 0x2c9   :  { %v1423_v62 = vmax.f32 %v1386_v32, 0.0 }
 0x2cb   :  { %2844 = vmatmul.mubr.msk.f32.gmra.mrb[54].mxu1 %vm1153_vm11, %v1423_v62 }
 0x2cc   :  { %2846 = vmatprep.mubr.msk.f32.mxu1 %vm3013_vm0, %v3014_v8 }
 0x2d6   :  { %v1390_v53 = vpop.f32.mrb[36].mxu0 }
 0x2d7   :  { %v1391_v18 = vadd.f32 %v4121_v22, %v1390_v53  ;;  %v2813_v45 = vpop.f32.mrb[37].mxu0 }
 0x2d9   :  { %v1424_v19 = vmax.f32 %v1391_v18, 0.0 }
 0x2db   :  { %2847 = vmatmul.mubr.msk.f32.gmra.mrb[56].mxu1 %vm1153_vm11, %v1424_v19 }
 0x2dc   :  { %2849 = vmatprep.mubr.msk.f32.mxu1 %vm3013_vm0, %v3014_v8 }
 0x2e6   :  { %v1395_v49 = vpop.f32.mrb[38].mxu0 }
 0x2e7   :  { %v1396_v54 = vadd.f32 %v4121_v22, %v1395_v49  ;;  %v2816_v29 = vpop.f32.mrb[39].mxu0 }
 0x2e9   :  { %v1425_v55 = vmax.f32 %v1396_v54, 0.0 }
 0x2eb   :  { %2850 = vmatmul.mubr.msk.f32.gmra.mrb[58].mxu1 %vm1153_vm11, %v1425_v55 }
 0x2ec   :  { %2852 = vmatprep.mubr.msk.f32.mxu1 %vm3013_vm0, %v3014_v8 }
 0x2f6   :  { %v1400_v56 = vpop.f32.mrb[40].mxu0 }
 0x2f7   :  { %v1401_v57 = vadd.f32 %v4121_v22, %v1400_v56  ;;  %v2819_v20 = vpop.f32.mrb[41].mxu0  ;;  %v4208_v56 = vld [vmem:[%s4610_s12] ss:$0 sm:$0xff]  ;;  %s3025_s12 = smov 2  }
 0x2f9   :  { %v1426_v17 = vmax.f32 %v1401_v57, 0.0 }
 0x2fb   :  { %2853 = vmatmul.mubr.msk.f32.gmra.mrb[60].mxu1 %vm1153_vm11, %v1426_v17 }
 0x2fc   :  { %2855 = vmatprep.mubr.msk.f32.mxu1 %vm3013_vm0, %v3014_v8 }
 0x30a   :  { %v1405_v59 = vpop.f32.mrb[42].mxu0 }
 0x30b   :  { %v1406_v2 = vadd.f32 %v4121_v22, %v1405_v59  ;;  %v2822_v37 = vpop.f32.mrb[43].mxu0 }
 0x30d   :  { %v1427_v1 = vmax.f32 %v1406_v2, 0.0 }
 0x30f   :  { %2856 = vmatmul.mubr.msk.f32.gmra.mrb[62].mxu1 %vm1153_vm11, %v1427_v1 }
 0x310   :  { %2858 = vmatprep.mubr.msk.f32.mxu1 %vm3013_vm0, %v3014_v8 }
 0x319   :  { %v1410_v13 = vpop.f32.mrb[44].mxu0 }
 0x31a   :  { %v1411_v23 = vadd.f32 %v4121_v22, %v1410_v13  ;;  %v2825_v50 = vpop.f32.mrb[45].mxu0 }
 0x31c   :  { %v1428_v44 = vmax.f32 %v1411_v23, 0.0 }
 0x31e   :  { %v1415_v12 = vpop.f32.mrb[46].mxu0  ;;  %2859 = vmatmul.mubr.msk.f32.gmra.mrb[64].mxu1 %vm1153_vm11, %v1428_v44 }
 0x31f   :  { %v1416_v38 = vadd.f32 %v4121_v22, %v1415_v12  ;;  %v2828_v4 = vpop.f32.mrb[47].mxu0  ;;  %2861 = vmatprep.mubr.msk.f32.mxu1 %vm3013_vm0, %v3014_v8 }
 0x321   :  { %v1429_v5 = vmax.f32 %v1416_v38, 0.0 }
 0x323   :  { %2862 = vmatmul.mubr.msk.f32.gmra.mrb[66].mxu1 %vm1153_vm11, %v1429_v5 }
 0x324   :  { %2905 = vmatprep.mubr.msk.f32.mxu1 %vm3013_vm0, %v3014_v8 }
 0x35e   :  { %v1537_v33 = vpop.f32.mrb[48].mxu0 }
 0x35f   :  { %v1538_v6 = vadd.f32 %v2490_v9, %v1537_v33  ;;  %v2833_v42 = vpop.f32.mrb[49].mxu0 }
 0x361   :  { %v1591_v40 = vmax.f32 %v1538_v6, 0.0 }
 0x363   :  { %2867 = vmatmul.mubr.msk.f32.vlgmr.msra.gmra.mrb[54].mxu0 %vm4616_vm5, %v1591_v40  ;;  %vm4623_vm5 = vmmov %vm4620_vm2 }
 0x364   :  { %2869 = vmatprep.mubr.msk.f32.mxu0 %vm3013_vm0, %v3014_v8 }
 0x36e   :  { %v1542_v26 = vpop.f32.mrb[50].mxu0 }
 0x36f   :  { %v1543_v25 = vadd.f32 %v2490_v9, %v1542_v26  ;;  %v2836_v10 = vpop.f32.mrb[51].mxu0 }
 0x370   :  { %v2198_v10 = vld [vmem:[%s4611_s13 + $0x8] sm:$0xff] }
 0x371   :  { %v1592_v31 = vmax.f32 %v1543_v25, 0.0  ;;  %v2197_v25 = vld [vmem:[%s4611_s13] sm:$0xff] }
 0x373   :  { %2870 = vmatmul.mubr.msk.f32.gmra.mrb[56].mxu0 %vm4617_vm13, %v1592_v31  ;;  %vm4624_vm13 = vmmov %vm4620_vm2  ;;  %v2987_v31 = vpack.c.bf16 %v2198_v10, %v2197_v25 }
 0x374   :  { %2872 = vmatprep.mubr.msk.f32.mxu0 %vm3013_vm0, %v3014_v8 }
 0x375   :  { %2988 = vmatpush3.bf16.msra.mxu1 %v2987_v31 }
 0x376   :  { %2903 = vmatprep.subr.mxu1 %v3014_v8 }
 0x37e   :  { %v1547_v61 = vpop.f32.mrb[52].mxu0 }
 0x37f   :  { %v1548_v41 = vadd.f32 %v2490_v9, %v1547_v61  ;;  %v2839_v47 = vpop.f32.mrb[53].mxu0 }
 0x381   :  { %v1593_v35 = vmax.f32 %v1548_v41, 0.0 }
 0x383   :  { %2873 = vmatmul.mubr.msk.f32.gmra.mrb[58].mxu0 %vm4618_vm14, %v1593_v35  ;;  %vm4625_vm14 = vmmov %vm4620_vm2 }
 0x384   :  { %2875 = vmatprep.mubr.msk.f32.mxu0 %vm3013_vm0, %v3014_v8 }
 0x38e   :  { %v1552_v51 = vpop.f32.mrb[52].mxu1 }
 0x38f   :  { %v1553_v30 = vadd.f32 %v2490_v9, %v1552_v51  ;;  %v2842_v48 = vpop.f32.mrb[53].mxu1  ;;  %v2199_v51 = vld [vmem:[%s4611_s13 + $0x10] sm:$0x3]  ;;  %s3029_s13 = smov 14  }
 0x390   :  { %2904 = vmatpush3.msk.msra.mxu1 %vm857_vm7, %v2199_v51 }
 0x391   :  { %v1594_v0 = vmax.f32 %v1553_v30, 0.0 }
 0x393   :  { %2876 = vmatmul.mubr.msk.f32.gmra.mrb[60].mxu0 %vm4619_vm15, %v1594_v0  ;;  %vm4626_vm15 = vmmov %vm4620_vm2 }
 0x394   :  { %2878 = vmatprep.mubr.msk.f32.mxu0 %vm3013_vm0, %v3014_v8 }
 0x39e   :  { %v1557_v22 = vpop.f32.mrb[54].mxu1 }
 0x39f   :  { %v1558_v3 = vadd.f32 %v2490_v9, %v1557_v22  ;;  %v2845_v11 = vpop.f32.mrb[55].mxu1 }
 0x3a1   :  { %v1595_v52 = vmax.f32 %v1558_v3, 0.0 }
 0x3a3   :  { %2879 = vmatmul.mubr.msk.f32.gmra.mrb[62].mxu0 %vm4620_vm2, %v1595_v52  ;;  %vm2120_vm2 = vcmask 15360  }
 0x3a4   :  { %2881 = vmatprep.mubr.msk.f32.mxu0 %vm3013_vm0, %v3014_v8 }
 0x3ae   :  { %v1562_v60 = vpop.f32.mrb[56].mxu1 }
 0x3af   :  { %v1563_v14 = vadd.f32 %v2490_v9, %v1562_v60  ;;  %v2848_v27 = vpop.f32.mrb[57].mxu1 }
 0x3b1   :  { %v1596_v15 = vmax.f32 %v1563_v14, 0.0 }
 0x3b3   :  { %2882 = vmatmul.mubr.msk.f32.gmra.mrb[64].mxu0 %vm4621_vm3, %v1596_v15  ;;  %vm2139_vm3 = vcmask 48128  }
 0x3b4   :  { %2884 = vmatprep.mubr.msk.f32.mxu0 %vm3013_vm0, %v3014_v8 }
 0x3be   :  { %v1567_v39 = vpop.f32.mrb[58].mxu1 }
 0x3bf   :  { %v1568_v21 = vadd.f32 %v2490_v9, %v1567_v39  ;;  %v2851_v24 = vpop.f32.mrb[59].mxu1 }
 0x3c1   :  { %v1597_v63 = vmax.f32 %v1568_v21, 0.0 }
 0x3c3   :  { %2885 = vmatmul.mubr.msk.f32.gmra.mrb[66].mxu0 %vm4622_vm4, %v1597_v63 }
 0x3c4   :  { %2887 = vmatprep.mubr.msk.f32.mxu0 %vm3013_vm0, %v3014_v8 }
 0x3ce   :  { %v1572_v28 = vpop.f32.mrb[60].mxu1 }
 0x3cf   :  { %v1573_v58 = vadd.f32 %v2490_v9, %v1572_v28  ;;  %v2854_v16 = vpop.f32.mrb[61].mxu1 }
 0x3d1   :  { %v1598_v7 = vmax.f32 %v1573_v58, 0.0 }
 0x3d3   :  { %2888 = vmatmul.mubr.msk.f32.gmra.mrb[68].mxu0 %vm4623_vm5, %v1598_v7  ;;  %vm2158_vm5 = vcmask 80896  }
 0x3d4   :  { %2890 = vmatprep.mubr.msk.f32.mxu0 %vm3013_vm0, %v3014_v8 }
 0x3e2   :  { %v1577_v34 = vpop.f32.mrb[62].mxu1 }
 0x3e3   :  { %v1578_v36 = vadd.f32 %v2490_v9, %v1577_v34  ;;  %v2857_v32 = vpop.f32.mrb[63].mxu1 }
 0x3e5   :  { %v1599_v43 = vmax.f32 %v1578_v36, 0.0 }
 0x3e7   :  { %2891 = vmatmul.mubr.msk.f32.gmra.mrb[70].mxu0 %vm4624_vm13, %v1599_v43  ;;  %vm2168_vm13 = vcmask 97280  }
 0x3e8   :  { %2893 = vmatprep.mubr.msk.f32.mxu0 %vm3013_vm0, %v3014_v8 }
 0x3f1   :  { %v1582_v62 = vpop.f32.mrb[64].mxu1 }
 0x3f2   :  { %v1583_v53 = vadd.f32 %v2490_v9, %v1582_v62  ;;  %v2860_v18 = vpop.f32.mrb[65].mxu1 }
 0x3f4   :  { %v1600_v45 = vmax.f32 %v1583_v53, 0.0 }
 0x3f6   :  { %v1587_v19 = vpop.f32.mrb[66].mxu1  ;;  %2894 = vmatmul.mubr.msk.f32.gmra.mrb[72].mxu0 %vm4625_vm14, %v1600_v45  ;;  %vm2178_vm14 = vcmask 113664  }
 0x3f7   :  { %v1588_v46 = vadd.f32 %v2490_v9, %v1587_v19  ;;  %v2863_v49 = vpop.f32.mrb[67].mxu1  ;;  %2896 = vmatprep.mubr.msk.f32.mxu0 %vm3013_vm0, %v3014_v8 }
 0x3f9   :  { %v1601_v54 = vmax.f32 %v1588_v46, 0.0 }
 0x3fb   :  { %2897 = vmatmul.mubr.msk.f32.gmra.mrb[74].mxu0 %vm4626_vm15, %v1601_v54  ;;  %vm2207_vm15 = vcmask 146432  }
 0x436   :  { %v1712_v29 = vpop.f32.mrb[54].mxu0 }
 0x437   :  { %v2868_v55 = vpop.f32.mrb[55].mxu0  ;;  %v1713_v57 = vadd.f32 %v4208_v56, %v1712_v29 }
 0x439   :  { %v4211_v17 = vmax.f32 %v1713_v57, 0.0 }
 0x43b   :  { %v1787_v1 = vrot.slane %v4211_v17, 1  ;;  %v1833_v23 = vrot.slane %v4211_v17, 2  ;;  %v1879_v5 = vrot.slane %v4211_v17, 6  ;;  %v1925_v9 = vrot.slane %v4211_v17, 7 }
 0x446   :  { %v1717_v20 = vpop.f32.mrb[56].mxu0 }
 0x447   :  { %v1718_v59 = vadd.f32 %v4208_v56, %v1717_v20  ;;  %v2871_v2 = vpop.f32.mrb[57].mxu0 }
 0x449   :  { %v4214_v37 = vmax.f32 %v1718_v59, 0.0 }
 0x44b   :  { %1971 = vrot.lane.b32.xlu1 %v4214_v37, %s3024_s3  ;;  %v1788_v13 = vrot.slane %v4214_v37, 1  ;;  %v1834_v50 = vrot.slane %v4214_v37, 2  ;;  %v1880_v38 = vrot.slane %v4214_v37, 6  ;;  %v1926_v4 = vrot.slane %v4214_v37, 7 }
 0x44c   :  { %v1999_v47 = vrot.slane %v4214_v37, 4  ;;  %v2045_v3 = vrot.slane %v4214_v37, 5 }
 0x44d   :  { %v1789_v44 = vsel %vm746_vm6, %v1787_v1, %v1788_v13  ;;  %v1835_v12 = vsel %vm801_vm8, %v1833_v23, %v1834_v50  ;;  %v1881_v33 = vsel %vm857_vm7, %v1879_v5, %v1880_v38  ;;  %v1927_v6 = vsel %vm914_vm9, %v1925_v9, %v1926_v4 }
 0x44e   :  { %1806 = vrot.lane.b32.xlu0 %v1789_v44, %s3025_s12 }
 0x44f   :  { %1852 = vrot.lane.b32.xlu1 %v1835_v12, %s3026_s17 }
 0x452   :  { %1898 = vrot.lane.b32.xlu0 %v1881_v33, %s3027_s5 }
 0x453   :  { %1944 = vrot.lane.b32.xlu1 %v1927_v6, %s3017_s29 }
 0x456   :  { %v1722_v42 = vpop.f32.mrb[58].mxu0 }
 0x457   :  { %v1723_v40 = vadd.f32 %v4208_v56, %v1722_v42  ;;  %v2874_v26 = vpop.f32.mrb[59].mxu0 }
 0x459   :  { %v4241_v61 = vmax.f32 %v1723_v40, 0.0 }
 0x45b   :  { %1973 = vrot.lane.b32.xlu1 %v4241_v61, %s3024_s3  ;;  %v1790_v41 = vrot.slane %v4241_v61, 1  ;;  %v2000_v35 = vrot.slane %v4241_v61, 4  ;;  %v1836_v0 = vrot.slane %v4241_v61, 2  ;;  %v2046_v22 = vrot.slane %v4241_v61, 5 }
 0x45c   :  { %v1882_v52 = vrot.slane %v4241_v61, 6  ;;  %v1928_v27 = vrot.slane %v4241_v61, 7 }
 0x45d   :  { %v1791_v30 = vsel %vm746_vm6, %v1788_v13, %v1790_v41  ;;  %v2001_v48 = vsel %vm172_vm1, %v1999_v47, %v2000_v35  ;;  %v1837_v11 = vsel %vm801_vm8, %v1834_v50, %v1836_v0  ;;  %v2047_v60 = vsel %vm1061_vm10, %v2045_v3, %v2046_v22 }
 0x45e   :  { %1808 = vrot.lane.b32.xlu0 %v1791_v30, %s3025_s12  ;;  %v1883_v14 = vsel %vm857_vm7, %v1880_v38, %v1882_v52  ;;  %v1929_v63 = vsel %vm914_vm9, %v1926_v4, %v1928_v27 }
 0x45f   :  { %2018 = vrot.lane.b32.xlu1 %v2001_v48, %s3028_s6 }
 0x462   :  { %1854 = vrot.lane.b32.xlu0 %v1837_v11, %s3026_s17 }
 0x463   :  { %2064 = vrot.lane.b32.xlu1 %v2047_v60, %s3029_s13 }
 0x466   :  { %1900 = vrot.lane.b32.xlu0 %v1883_v14, %s3027_s5  ;;  %v1727_v15 = vpop.f32.mrb[60].mxu0 }
 0x467   :  { %v1728_v39 = vadd.f32 %v4208_v56, %v1727_v15  ;;  %2093 = vrot.lane.b32.xlu1 %v1883_v14, %s3019_s16  ;;  %v2877_v21 = vpop.f32.mrb[61].mxu0 }
 0x469   :  { %v4270_v24 = vmax.f32 %v1728_v39, 0.0 }
 0x46a   :  { %1946 = vrot.lane.b32.xlu0 %v1929_v63, %s3017_s29 }
 0x46b   :  { %1975 = vrot.lane.b32.xlu1 %v4270_v24, %s3024_s3  ;;  %v1792_v28 = vrot.slane %v4270_v24, 1  ;;  %v2002_v58 = vrot.slane %v4270_v24, 4  ;;  %v1838_v34 = vrot.slane %v4270_v24, 2  ;;  %v2048_v36 = vrot.slane %v4270_v24, 5 }
 0x46c   :  { %v1884_v43 = vrot.slane %v4270_v24, 6  ;;  %v1930_v18 = vrot.slane %v4270_v24, 7 }
 0x46d   :  { %v1793_v16 = vsel %vm746_vm6, %v1790_v41, %v1792_v28  ;;  %v2003_v7 = vsel %vm172_vm1, %v2000_v35, %v2002_v58  ;;  %v1839_v32 = vsel %vm801_vm8, %v1836_v0, %v1838_v34  ;;  %v2049_v62 = vsel %vm1061_vm10, %v2046_v22, %v2048_v36 }
 0x46e   :  { %1810 = vrot.lane.b32.xlu0 %v1793_v16, %s3025_s12  ;;  %v1885_v53 = vsel %vm857_vm7, %v1882_v52, %v1884_v43  ;;  %v1931_v54 = vsel %vm914_vm9, %v1928_v27, %v1930_v18 }
 0x46f   :  { %2020 = vrot.lane.b32.xlu1 %v2003_v7, %s3028_s6 }
 0x472   :  { %1856 = vrot.lane.b32.xlu0 %v1839_v32, %s3026_s17 }
 0x473   :  { %2066 = vrot.lane.b32.xlu1 %v2049_v62, %s3029_s13 }
 0x476   :  { %1902 = vrot.lane.b32.xlu0 %v1885_v53, %s3027_s5  ;;  %v1732_v45 = vpop.f32.mrb[62].mxu0 }
 0x477   :  { %v1733_v19 = vadd.f32 %v4208_v56, %v1732_v45  ;;  %2095 = vrot.lane.b32.xlu1 %v1885_v53, %s3019_s16  ;;  %v2880_v46 = vpop.f32.mrb[63].mxu0 }
 0x479   :  { %v4294_v49 = vmax.f32 %v1733_v19, 0.0  ;;  %v3030_v19 = vmov 0  }
 0x47a   :  { %1948 = vrot.lane.b32.xlu0 %v1931_v54, %s3017_s29  ;;  %3011 = vset.pattern.permute.xlu1 %v3030_v19 }
 0x47b   :  { %1977 = vrot.lane.b32.xlu1 %v4294_v49, %s3024_s3  ;;  %v1794_v29 = vrot.slane %v4294_v49, 1  ;;  %v2004_v55 = vrot.slane %v4294_v49, 4  ;;  %v1840_v59 = vrot.slane %v4294_v49, 2  ;;  %v2050_v2 = vrot.slane %v4294_v49, 5  ;;  %3010 = vset.pattern.permute.xlu0 %v3030_v19 }
 0x47c   :  { %v1886_v13 = vrot.slane %v4294_v49, 6  ;;  %v1932_v44 = vrot.slane %v4294_v49, 7 }
 0x47d   :  { %v1795_v57 = vsel %vm746_vm6, %v1792_v28, %v1794_v29  ;;  %v2005_v20 = vsel %vm172_vm1, %v2002_v58, %v2004_v55  ;;  %v1841_v1 = vsel %vm801_vm8, %v1838_v34, %v1840_v59  ;;  %v2051_v23 = vsel %vm1061_vm10, %v2048_v36, %v2050_v2 }
 0x47e   :  { %1812 = vrot.lane.b32.xlu0 %v1795_v57, %s3025_s12  ;;  %v1887_v50 = vsel %vm857_vm7, %v1884_v43, %v1886_v13  ;;  %v1933_v9 = vsel %vm914_vm9, %v1930_v18, %v1932_v44 }
 0x47f   :  { %2022 = vrot.lane.b32.xlu1 %v2005_v20, %s3028_s6 }
 0x482   :  { %1858 = vrot.lane.b32.xlu0 %v1841_v1, %s3026_s17 }
 0x483   :  { %2068 = vrot.lane.b32.xlu1 %v2051_v23, %s3029_s13 }
 0x486   :  { %1904 = vrot.lane.b32.xlu0 %v1887_v50, %s3027_s5  ;;  %v1737_v12 = vpop.f32.mrb[64].mxu0 }
 0x487   :  { %v1738_v38 = vadd.f32 %v4208_v56, %v1737_v12  ;;  %2097 = vrot.lane.b32.xlu1 %v1887_v50, %s3019_s16  ;;  %v2883_v4 = vpop.f32.mrb[65].mxu0 }
 0x489   :  { %v4318_v5 = vmax.f32 %v1738_v38, 0.0 }
 0x48a   :  { %1950 = vrot.lane.b32.xlu0 %v1933_v9, %s3017_s29 }
 0x48b   :  { %1979 = vrot.lane.b32.xlu1 %v4318_v5, %s3024_s3  ;;  %v1796_v33 = vrot.slane %v4318_v5, 1  ;;  %v2006_v6 = vrot.slane %v4318_v5, 4  ;;  %v1842_v26 = vrot.slane %v4318_v5, 2  ;;  %v2052_v25 = vrot.slane %v4318_v5, 5 }
 0x48c   :  { %v1888_v31 = vrot.slane %v4318_v5, 6  ;;  %v1934_v35 = vrot.slane %v4318_v5, 7 }
 0x48d   :  { %v1797_v42 = vsel %vm746_vm6, %v1794_v29, %v1796_v33  ;;  %v2007_v40 = vsel %vm172_vm1, %v2004_v55, %v2006_v6  ;;  %v1843_v10 = vsel %vm801_vm8, %v1840_v59, %v1842_v26  ;;  %v2053_v41 = vsel %vm1061_vm10, %v2050_v2, %v2052_v25 }
 0x48e   :  { %1814 = vrot.lane.b32.xlu0 %v1797_v42, %s3025_s12  ;;  %v1889_v47 = vsel %vm857_vm7, %v1886_v13, %v1888_v31  ;;  %v1935_v22 = vsel %vm914_vm9, %v1932_v44, %v1934_v35 }
 0x48f   :  { %2024 = vrot.lane.b32.xlu1 %v2007_v40, %s3028_s6 }
 0x492   :  { %1860 = vrot.lane.b32.xlu0 %v1843_v10, %s3026_s17 }
 0x493   :  { %2070 = vrot.lane.b32.xlu1 %v2053_v41, %s3029_s13 }
 0x496   :  { %1906 = vrot.lane.b32.xlu0 %v1889_v47, %s3027_s5  ;;  %v1742_v51 = vpop.f32.mrb[66].mxu0 }
 0x497   :  { %v1743_v30 = vadd.f32 %v4208_v56, %v1742_v51  ;;  %2099 = vrot.lane.b32.xlu1 %v1889_v47, %s3019_s16  ;;  %v2886_v48 = vpop.f32.mrb[67].mxu0 }
 0x499   :  { %v4342_v0 = vmax.f32 %v1743_v30, 0.0 }
 0x49a   :  { %1952 = vrot.lane.b32.xlu0 %v1935_v22, %s3017_s29 }
 0x49b   :  { %1981 = vrot.lane.b32.xlu1 %v4342_v0, %s3024_s3  ;;  %v1798_v3 = vrot.slane %v4342_v0, 1  ;;  %v2008_v11 = vrot.slane %v4342_v0, 4  ;;  %v1844_v14 = vrot.slane %v4342_v0, 2  ;;  %v2054_v27 = vrot.slane %v4342_v0, 5 }
 0x49c   :  { %v1890_v39 = vrot.slane %v4342_v0, 6  ;;  %v1936_v28 = vrot.slane %v4342_v0, 7 }
 0x49d   :  { %v1799_v52 = vsel %vm746_vm6, %v1796_v33, %v1798_v3  ;;  %v2009_v60 = vsel %vm172_vm1, %v2006_v6, %v2008_v11  ;;  %v1845_v15 = vsel %vm801_vm8, %v1842_v26, %v1844_v14  ;;  %v2055_v21 = vsel %vm1061_vm10, %v2052_v25, %v2054_v27 }
 0x49e   :  { %1816 = vrot.lane.b32.xlu0 %v1799_v52, %s3025_s12  ;;  %v1891_v63 = vsel %vm857_vm7, %v1888_v31, %v1890_v39  ;;  %v1937_v36 = vsel %vm914_vm9, %v1934_v35, %v1936_v28 }
 0x49f   :  { %2026 = vrot.lane.b32.xlu1 %v2009_v60, %s3028_s6 }
 0x4a2   :  { %1862 = vrot.lane.b32.xlu0 %v1845_v15, %s3026_s17 }
 0x4a3   :  { %2072 = vrot.lane.b32.xlu1 %v2055_v21, %s3029_s13 }
 0x4a6   :  { %1908 = vrot.lane.b32.xlu0 %v1891_v63, %s3027_s5  ;;  %v1747_v58 = vpop.f32.mrb[68].mxu0 }
 0x4a7   :  { %v1748_v16 = vadd.f32 %v4208_v56, %v1747_v58  ;;  %2101 = vrot.lane.b32.xlu1 %v1891_v63, %s3019_s16  ;;  %v2889_v7 = vpop.f32.mrb[69].mxu0 }
 0x4a9   :  { %v4366_v34 = vmax.f32 %v1748_v16, 0.0 }
 0x4aa   :  { %1954 = vrot.lane.b32.xlu0 %v1937_v36, %s3017_s29 }
 0x4ab   :  { %1983 = vrot.lane.b32.xlu1 %v4366_v34, %s3024_s3  ;;  %v1800_v32 = vrot.slane %v4366_v34, 1  ;;  %v2010_v43 = vrot.slane %v4366_v34, 4  ;;  %v1846_v18 = vrot.slane %v4366_v34, 2  ;;  %v2056_v45 = vrot.slane %v4366_v34, 5 }
 0x4ac   :  { %v1892_v54 = vrot.slane %v4366_v34, 6  ;;  %v1938_v57 = vrot.slane %v4366_v34, 7 }
 0x4ad   :  { %v1801_v62 = vsel %vm746_vm6, %v1798_v3, %v1800_v32  ;;  %v2011_v53 = vsel %vm172_vm1, %v2008_v11, %v2010_v43  ;;  %v1847_v46 = vsel %vm801_vm8, %v1844_v14, %v1846_v18  ;;  %v2057_v29 = vsel %vm1061_vm10, %v2054_v27, %v2056_v45 }
 0x4ae   :  { %1818 = vrot.lane.b32.xlu0 %v1801_v62, %s3025_s12  ;;  %v1893_v55 = vsel %vm857_vm7, %v1890_v39, %v1892_v54  ;;  %v1939_v20 = vsel %vm914_vm9, %v1936_v28, %v1938_v57 }
 0x4af   :  { %2028 = vrot.lane.b32.xlu1 %v2011_v53, %s3028_s6 }
 0x4b2   :  { %1864 = vrot.lane.b32.xlu0 %v1847_v46, %s3026_s17 }
 0x4b3   :  { %2074 = vrot.lane.b32.xlu1 %v2057_v29, %s3029_s13 }
 0x4b6   :  { %1910 = vrot.lane.b32.xlu0 %v1893_v55, %s3027_s5 }
 0x4b7   :  { %2103 = vrot.lane.b32.xlu1 %v1893_v55, %s3019_s16 }
 0x4ba   :  { %1956 = vrot.lane.b32.xlu0 %v1939_v20, %s3017_s29  ;;  %v1752_v59 = vpop.f32.mrb[70].mxu0 }
 0x4bb   :  { %v1753_v2 = vadd.f32 %v4208_v56, %v1752_v59  ;;  %v2892_v1 = vpop.f32.mrb[71].mxu0 }
 0x4bd   :  { %v4392_v13 = vmax.f32 %v1753_v2, 0.0  ;;  %v4394_v23 = vpop.permute.xlu1 %1971 }
 0x4bf   :  { %1985 = vrot.lane.b32.xlu1 %v4392_v13, %s3024_s3  ;;  %v1802_v50 = vrot.slane %v4392_v13, 1  ;;  %v2012_v44 = vrot.slane %v4392_v13, 4  ;;  %v1848_v4 = vrot.slane %v4392_v13, 2  ;;  %v2058_v9 = vrot.slane %v4392_v13, 5 }
 0x4c0   :  { %v1894_v42 = vrot.slane %v4392_v13, 6  ;;  %v1807_v40 = vpop.permute.xlu0 %1806  ;;  %v1940_v41 = vrot.slane %v4392_v13, 7 }
 0x4c1   :  { %v1803_v12 = vsel %vm746_vm6, %v1800_v32, %v1802_v50  ;;  %v2013_v38 = vsel %vm172_vm1, %v2010_v43, %v2012_v44  ;;  %v1853_v33 = vpop.permute.xlu1 %1852  ;;  %v1849_v6 = vsel %vm801_vm8, %v1846_v18, %v1848_v4  ;;  %v2059_v26 = vsel %vm1061_vm10, %v2056_v45, %v2058_v9 }
 0x4c2   :  { %1820 = vrot.lane.b32.xlu0 %v1803_v12, %s3025_s12  ;;  %v1895_v31 = vsel %vm857_vm7, %v1892_v54, %v1894_v42  ;;  %v2121_v48 = vsel %vm2120_vm2, %v4211_v17, %v1807_v40  ;;  %v1941_v3 = vsel %vm914_vm9, %v1938_v57, %v1940_v41 }
 0x4c3   :  { %2030 = vrot.lane.b32.xlu1 %v2013_v38, %s3028_s6  ;;  %v2130_v27 = vsel %vm4622_vm4, %v2121_v48, %v1853_v33 }
 0x4c4   :  { %v1899_v51 = vpop.permute.xlu0 %1898 }
 0x4c5   :  { %v1945_v25 = vpop.permute.xlu1 %1944  ;;  %v2140_v21 = vsel %vm2139_vm3, %v2130_v27, %v1899_v51 }
 0x4c6   :  { %1866 = vrot.lane.b32.xlu0 %v1849_v6, %s3026_s17  ;;  %v2149_v32 = vsel %vm1153_vm11, %v2140_v21, %v1945_v25  ;;  %v2355_v21 = vld [vmem:[%s4612_s2 + $0x38] sm:$0xff] }
 0x4c7   :  { %2076 = vrot.lane.b32.xlu1 %v2059_v26, %s3029_s13  ;;  %v2159_v29 = vsel %vm2158_vm5, %v2149_v32, %v4394_v23 }
 0x4c9   :  { %v1757_v10 = vpop.f32.mrb[72].mxu0 }
 0x4ca   :  { %v1758_v47 = vadd.f32 %v4208_v56, %v1757_v10  ;;  %1912 = vrot.lane.b32.xlu0 %v1895_v31, %s3027_s5  ;;  %v2895_v35 = vpop.f32.mrb[73].mxu0  ;;  %v2356_v10 = vld [vmem:[%s4612_s2 + $0x40] sm:$0xff] }
 0x4cb   :  { %2105 = vrot.lane.b32.xlu1 %v1895_v31, %s3019_s16 }
 0x4cc   :  { %v1775_v30 = vmax.f32 %v1758_v47, 0.0 }
 0x4cd   :  { %v4420_v22 = vpop.permute.xlu1 %1973 }
 0x4ce   :  { %1958 = vrot.lane.b32.xlu0 %v1941_v3, %s3017_s29  ;;  %v1762_v11 = vpop.f32.mrb[74].mxu0  ;;  %v2014_v52 = vrot.slane %v1775_v30, 4  ;;  %v2060_v17 = vrot.slane %v1775_v30, 5  ;;  %v1804_v58 = vrot.slane %v1775_v30, 1  ;;  %v1896_v36 = vrot.slane %v1775_v30, 6  ;;  %v2350_v3 = vld [vmem:[%s4612_s2 + $0x10] sm:$0xff] }
 0x4cf   :  { %v1763_v60 = vadd.f32 %v4208_v56, %v1762_v11  ;;  %v2898_v14 = vpop.f32.mrb[75].mxu0  ;;  %v1850_v53 = vrot.slane %v1775_v30, 2  ;;  %v1942_v12 = vrot.slane %v1775_v30, 7 }
 0x4d0   :  { %v1809_v15 = vpop.permute.xlu0 %1808  ;;  %v2015_v39 = vsel %vm172_vm1, %v2012_v44, %v2014_v52  ;;  %v2061_v62 = vsel %vm1061_vm10, %v2058_v9, %v2060_v17  ;;  %v1805_v45 = vsel %vm746_vm6, %v1802_v50, %v1804_v58  ;;  %v1897_v20 = vsel %vm857_vm7, %v1894_v42, %v1896_v36  ;;  %v2352_v42 = vld [vmem:[%s4612_s2 + $0x20] sm:$0xff]  ;;  %v2351_v14 = vld [vmem:[%s4612_s2 + $0x18] sm:$0xff] }
 0x4d1   :  { %v1776_v63 = vmax.f32 %v1763_v60, 0.0  ;;  %v2019_v28 = vpop.permute.xlu1 %2018  ;;  %2032 = vrot.lane.b32.xlu1 %v2015_v39, %s3028_s6  ;;  %v1851_v1 = vsel %vm801_vm8, %v1848_v4, %v1850_v53  ;;  %v2122_v4 = vsel %vm2120_vm2, %v4214_v37, %v1809_v15  ;;  %v1943_v33 = vsel %vm914_vm9, %v1940_v41, %v1942_v12  ;;  %v2348_v41 = vld [vmem:[%s4612_s2] sm:$0xff]  ;;  %v2353_v60 = vld [vmem:[%s4612_s2 + $0x28] sm:$0xff] }
 0x4d2   :  { %1987 = vrot.lane.b32.xlu0 %v1775_v30, %s3024_s3  ;;  %v2169_v55 = vsel %vm2168_vm13, %v2159_v29, %v2019_v28  ;;  %v2354_v28 = vld [vmem:[%s4612_s2 + $0x30] sm:$0xff] }
 0x4d3   :  { %v2016_v16 = vrot.slane %v1776_v63, 4  ;;  %v2062_v7 = vrot.slane %v1776_v63, 5  ;;  %v2091_v56 = vrot.slane %v1776_v63, 6 }
 0x4d4   :  { %v1855_v43 = vpop.permute.xlu0 %1854 }
 0x4d5   :  { %v2065_v18 = vpop.permute.xlu1 %2064  ;;  %2078 = vrot.lane.b32.xlu1 %v2061_v62, %s3029_s13  ;;  %v2017_v19 = vsel %vm172_vm1, %v2014_v52, %v2016_v16  ;;  %v2092_v46 = vsel %vm857_vm7, %v1896_v36, %v2091_v56  ;;  %v2063_v54 = vsel %vm1061_vm10, %v2060_v17, %v2062_v7  ;;  %vm4627_vm1 = vmmov %vm4622_vm4 }
 0x4d6   :  { %1822 = vrot.lane.b32.xlu0 %v1805_v45, %s3025_s12  ;;  %v2179_v59 = vsel %vm2178_vm14, %v2169_v55, %v2065_v18  ;;  %v2131_v6 = vsel %vm4627_vm1, %v2122_v4, %v1855_v43  ;;  %vm4628_vm6 = vmmov %vm4627_vm1 }
 0x4d7   :  { %vm4629_vm7 = vmmov %vm4627_vm1 }
 0x4d8   :  { %v1901_v57 = vpop.permute.xlu0 %1900  ;;  %vm4630_vm8 = vmmov %vm4627_vm1 }
 0x4d9   :  { %v2094_v2 = vpop.permute.xlu1 %2093  ;;  %2107 = vrot.lane.b32.xlu1 %v1897_v20, %s3019_s16  ;;  %v2141_v40 = vsel %vm2139_vm3, %v2131_v6, %v1901_v57  ;;  %vm4631_vm10 = vmmov %vm4627_vm1 }
 0x4da   :  { %v2188_v50 = vsel %vm1165_vm12, %v2179_v59, %v2094_v2  ;;  %1868 = vrot.lane.b32.xlu0 %v1851_v1, %s3026_s17  ;;  %vm4632_vm4 = vmmov %vm4627_vm1 }
 0x4db   :  { %2906 = vmatmul.mubr.msk.f32.vlgmr.msra.gmra.mrb[68].mxu1 %vm2207_vm15, %v2188_v50 }
 0x4dc   :  { %v1947_v23 = vpop.permute.xlu0 %1946  ;;  %2908 = vmatprep.mubr.msk.f32.mxu1 %vm3013_vm0, %v3014_v8 }
 0x4dd   :  { %v1976_v44 = vpop.permute.xlu1 %1975  ;;  %2034 = vrot.lane.b32.xlu1 %v2017_v19, %s3028_s6  ;;  %v2150_v26 = vsel %vm1153_vm11, %v2141_v40, %v1947_v23 }
 0x4de   :  { %1914 = vrot.lane.b32.xlu0 %v1897_v20, %s3027_s5  ;;  %v2160_v31 = vsel %vm2158_vm5, %v2150_v26, %v4420_v22  ;;  %v2349_v22 = vld [vmem:[%s4612_s2 + $0x8] sm:$0xff] }
 0x4e0   :  { %v1811_v38 = vpop.permute.xlu0 %1810 }
 0x4e1   :  { %v2021_v9 = vpop.permute.xlu1 %2020  ;;  %2109 = vrot.lane.b32.xlu1 %v2092_v46, %s3019_s16  ;;  %v2123_v15 = vsel %vm2120_vm2, %v4241_v61, %v1811_v38 }
 0x4e2   :  { %1960 = vrot.lane.b32.xlu0 %v1943_v33, %s3017_s29  ;;  %v2170_v47 = vsel %vm2168_vm13, %v2160_v31, %v2021_v9 }
 0x4e4   :  { %v1857_v37 = vpop.permute.xlu0 %1856 }
 0x4e5   :  { %v2067_v25 = vpop.permute.xlu1 %2066  ;;  %2379 = vperm.xlu1 %3011, %v2352_v42   ;;  %v2132_v17 = vsel %vm4628_vm6, %v2123_v15, %v1857_v37  ;;  %vm4633_vm6 = vmmov %vm4627_vm1 }
 0x4e6   :  { %2080 = vrot.lane.b32.xlu0 %v2063_v54, %s3029_s13  ;;  %v2180_v51 = vsel %vm2178_vm14, %v2170_v47, %v2067_v25 }
 0x4e8   :  { %v1903_v35 = vpop.permute.xlu0 %1902 }
 0x4e9   :  { %v2096_v30 = vpop.permute.xlu1 %2095  ;;  %2399 = vperm.xlu1 %3011, %v2356_v10   ;;  %v2142_v63 = vsel %vm2139_vm3, %v2132_v17, %v1903_v35 }
 0x4ea   :  { %v2189_v48 = vsel %vm1165_vm12, %v2180_v51, %v2096_v30  ;;  %2359 = vperm.xlu0 %3010, %v2348_v41  }
 0x4eb   :  { %2909 = vmatmul.mubr.msk.f32.gmra.mrb[70].mxu1 %vm2207_vm15, %v2189_v48 }
 0x4ec   :  { %v1949_v11 = vpop.permute.xlu0 %1948  ;;  %2911 = vmatprep.mubr.msk.f32.mxu1 %vm3013_vm0, %v3014_v8 }
 0x4ed   :  { %v1978_v52 = vpop.permute.xlu1 %1977  ;;  %2369 = vperm.xlu1 %3011, %v2350_v3   ;;  %v2151_v58 = vsel %vm1153_vm11, %v2142_v63, %v1949_v11 }
 0x4ee   :  { %2364 = vperm.xlu0 %3010, %v2349_v22   ;;  %v2161_v61 = vsel %vm2158_vm5, %v2151_v58, %v1976_v44 }
 0x4f0   :  { %v1813_v27 = vpop.permute.xlu0 %1812 }
 0x4f1   :  { %v2023_v39 = vpop.permute.xlu1 %2022  ;;  %2384 = vperm.xlu1 %3011, %v2353_v60   ;;  %v2124_v19 = vsel %vm2120_vm2, %v4270_v24, %v1813_v27 }
 0x4f2   :  { %2374 = vperm.xlu0 %3010, %v2351_v14   ;;  %v2171_v56 = vsel %vm2168_vm13, %v2161_v61, %v2023_v39 }
 0x4f4   :  { %v1859_v16 = vpop.permute.xlu0 %1858 }
 0x4f5   :  { %v2069_v7 = vpop.permute.xlu1 %2068  ;;  %2394 = vperm.xlu1 %3011, %v2355_v21   ;;  %v2133_v54 = vsel %vm4629_vm7, %v2124_v19, %v1859_v16 }
 0x4f6   :  { %2389 = vperm.xlu0 %3010, %v2354_v28   ;;  %v2181_v32 = vsel %vm2178_vm14, %v2171_v56, %v2069_v7 }
 0x4f8   :  { %v1905_v36 = vpop.permute.xlu0 %1904 }
 0x4f9   :  { %v2098_v43 = vpop.permute.xlu1 %2097  ;;  %v2143_v29 = vsel %vm2139_vm3, %v2133_v54, %v1905_v36 }
 0x4fa   :  { %v2190_v62 = vsel %vm1165_vm12, %v2181_v32, %v2098_v43 }
 0x4fb   :  { %2912 = vmatmul.mubr.msk.f32.gmra.mrb[72].mxu1 %vm2207_vm15, %v2190_v62 }
 0x4fc   :  { %v1951_v53 = vpop.permute.xlu0 %1950  ;;  %2914 = vmatprep.mubr.msk.f32.mxu1 %vm3013_vm0, %v3014_v8 }
 0x4fd   :  { %v1980_v18 = vpop.permute.xlu1 %1979  ;;  %v2152_v55 = vsel %vm1153_vm11, %v2143_v29, %v1951_v53 }
 0x4fe   :  { %v2162_v59 = vsel %vm2158_vm5, %v2152_v55, %v1978_v52 }
 0x500   :  { %v1815_v45 = vpop.permute.xlu0 %1814 }
 0x501   :  { %v2025_v46 = vpop.permute.xlu1 %2024  ;;  %v2125_v4 = vsel %vm2120_vm2, %v4294_v49, %v1815_v45 }
 0x502   :  { %v2172_v2 = vsel %vm2168_vm13, %v2162_v59, %v2025_v46 }
 0x504   :  { %v1861_v57 = vpop.permute.xlu0 %1860 }
 0x505   :  { %v2071_v20 = vpop.permute.xlu1 %2070  ;;  %v2134_v33 = vsel %vm4630_vm8, %v2125_v4, %v1861_v57 }
 0x506   :  { %v2182_v50 = vsel %vm2178_vm14, %v2172_v2, %v2071_v20 }
 0x508   :  { %v1907_v1 = vpop.permute.xlu0 %1906 }
 0x509   :  { %v2100_v23 = vpop.permute.xlu1 %2099  ;;  %v2144_v6 = vsel %vm2139_vm3, %v2134_v33, %v1907_v1 }
 0x50a   :  { %v2191_v44 = vsel %vm1165_vm12, %v2182_v50, %v2100_v23 }
 0x50b   :  { %2915 = vmatmul.mubr.msk.f32.gmra.mrb[74].mxu1 %vm2207_vm15, %v2191_v44 }
 0x50c   :  { %v1953_v24 = vpop.permute.xlu0 %1952  ;;  %2917 = vmatprep.mubr.msk.f32.mxu1 %vm3013_vm0, %v3014_v8 }
 0x50d   :  { %v1982_v12 = vpop.permute.xlu1 %1981  ;;  %v2153_v42 = vsel %vm1153_vm11, %v2144_v6, %v1953_v24 }
 0x50e   :  { %v2163_v37 = vsel %vm2158_vm5, %v2153_v42, %v1980_v18 }
 0x510   :  { %v1817_v38 = vpop.permute.xlu0 %1816 }
 0x511   :  { %v2027_v9 = vpop.permute.xlu1 %2026  ;;  %v2126_v30 = vsel %vm2120_vm2, %v4318_v5, %v1817_v38 }
 0x512   :  { %v2173_v25 = vsel %vm2168_vm13, %v2163_v37, %v2027_v9 }
 0x514   :  { %v1863_v40 = vpop.permute.xlu0 %1862 }
 0x515   :  { %v2073_v26 = vpop.permute.xlu1 %2072  ;;  %v2135_v3 = vsel %vm4631_vm10, %v2126_v30, %v1863_v40 }
 0x516   :  { %v2183_v31 = vsel %vm2178_vm14, %v2173_v25, %v2073_v26 }
 0x518   :  { %v1909_v10 = vpop.permute.xlu0 %1908 }
 0x519   :  { %v2102_v41 = vpop.permute.xlu1 %2101  ;;  %v2145_v22 = vsel %vm2139_vm3, %v2135_v3, %v1909_v10  ;;  %v2515_v3 = vld [vmem:[%s4613_s14] ss:$0 sm:$0xff] }
 0x51a   :  { %v2192_v47 = vsel %vm1165_vm12, %v2183_v31, %v2102_v41 }
 0x51b   :  { %2918 = vmatmul.mubr.msk.f32.gmra.mrb[76].mxu1 %vm2207_vm15, %v2192_v47 }
 0x51c   :  { %v1955_v49 = vpop.permute.xlu0 %1954  ;;  %2920 = vmatprep.mubr.msk.f32.mxu1 %vm3013_vm0, %v3014_v8 }
 0x51d   :  { %v1984_v35 = vpop.permute.xlu1 %1983  ;;  %v2154_v11 = vsel %vm1153_vm11, %v2145_v22, %v1955_v49 }
 0x51e   :  { %v2164_v14 = vsel %vm2158_vm5, %v2154_v11, %v1982_v12 }
 0x520   :  { %v1819_v51 = vpop.permute.xlu0 %1818 }
 0x521   :  { %v2029_v48 = vpop.permute.xlu1 %2028  ;;  %v2127_v58 = vsel %vm2120_vm2, %v4342_v0, %v1819_v51 }
 0x522   :  { %v2174_v27 = vsel %vm2168_vm13, %v2164_v14, %v2029_v48 }
 0x524   :  { %v1865_v52 = vpop.permute.xlu0 %1864 }
 0x525   :  { %v2075_v60 = vpop.permute.xlu1 %2074  ;;  %v2136_v7 = vsel %vm4632_vm4, %v2127_v58, %v1865_v52 }
 0x526   :  { %v2184_v15 = vsel %vm2178_vm14, %v2174_v27, %v2075_v60 }
 0x528   :  { %v1911_v17 = vpop.permute.xlu0 %1910 }
 0x529   :  { %v2104_v39 = vpop.permute.xlu1 %2103  ;;  %v2146_v61 = vsel %vm2139_vm3, %v2136_v7, %v1911_v17 }
 0x52a   :  { %v2193_v21 = vsel %vm1165_vm12, %v2184_v15, %v2104_v39 }
 0x52b   :  { %2921 = vmatmul.mubr.msk.f32.gmra.mrb[78].mxu1 %vm2207_vm15, %v2193_v21 }
 0x52c   :  { %2923 = vmatprep.mubr.msk.f32.mxu1 %vm3013_vm0, %v3014_v8  ;;  %v1957_v5 = vpop.permute.xlu0 %1956 }
 0x52d   :  { %v2155_v56 = vsel %vm1153_vm11, %v2146_v61, %v1957_v5 }
 0x52e   :  { %v2165_v43 = vsel %vm2158_vm5, %v2155_v56, %v1984_v35 }
 0x531   :  { %v1986_v63 = vpop.permute.xlu1 %1985 }
 0x534   :  { %v1821_v28 = vpop.permute.xlu0 %1820 }
 0x535   :  { %v2031_v16 = vpop.permute.xlu1 %2030  ;;  %v2128_v46 = vsel %vm2120_vm2, %v4366_v34, %v1821_v28 }
 0x536   :  { %v2175_v62 = vsel %vm2168_vm13, %v2165_v43, %v2031_v16 }
 0x538   :  { %v1867_v36 = vpop.permute.xlu0 %1866 }
 0x539   :  { %v2077_v32 = vpop.permute.xlu1 %2076  ;;  %v2137_v54 = vsel %vm4627_vm1, %v2128_v46, %v1867_v36 }
 0x53a   :  { %v2185_v18 = vsel %vm2178_vm14, %v2175_v62, %v2077_v32 }
 0x53c   :  { %v1913_v53 = vpop.permute.xlu0 %1912 }
 0x53d   :  { %v2106_v45 = vpop.permute.xlu1 %2105  ;;  %v2147_v29 = vsel %vm2139_vm3, %v2137_v54, %v1913_v53 }
 0x53e   :  { %v2194_v19 = vsel %vm1165_vm12, %v2185_v18, %v2106_v45 }
 0x53f   :  { %2924 = vmatmul.mubr.msk.f32.gmra.mrb[80].mxu1 %vm2207_vm15, %v2194_v19 }
 0x540   :  { %v1959_v0 = vpop.permute.xlu0 %1958  ;;  %2926 = vmatprep.mubr.msk.f32.mxu1 %vm3013_vm0, %v3014_v8 }
 0x541   :  { %v2156_v57 = vsel %vm1153_vm11, %v2147_v29, %v1959_v0 }
 0x542   :  { %v2166_v59 = vsel %vm2158_vm5, %v2156_v57, %v1986_v63 }
 0x543   :  { %v2033_v55 = vpop.permute.xlu1 %2032 }
 0x544   :  { %v1988_v20 = vpop.permute.xlu0 %1987  ;;  %v2176_v50 = vsel %vm2168_vm13, %v2166_v59, %v2033_v55 }
 0x547   :  { %v2079_v2 = vpop.permute.xlu1 %2078 }
 0x548   :  { %v1823_v1 = vpop.permute.xlu0 %1822  ;;  %v2186_v23 = vsel %vm2178_vm14, %v2176_v50, %v2079_v2 }
 0x549   :  { %v2129_v38 = vsel %vm2120_vm2, %v4392_v13, %v1823_v1  ;;  %vm2444_vm2 = vcmask 123904  }
 0x54b   :  { %v2108_v44 = vpop.permute.xlu1 %2107 }
 0x54c   :  { %v2195_v24 = vsel %vm1165_vm12, %v2186_v23, %v2108_v44  ;;  %v1869_v34 = vpop.permute.xlu0 %1868 }
 0x54d   :  { %2927 = vmatmul.mubr.msk.f32.gmra.mrb[82].mxu1 %vm2207_vm15, %v2195_v24  ;;  %v2138_v4 = vsel %vm4633_vm6, %v2129_v38, %v1869_v34 }
 0x54e   :  { %2929 = vmatprep.mubr.msk.f32.mxu1 %vm3013_vm0, %v3014_v8  ;;  %vm2415_vm0 = vcmask 125952  }
 0x54f   :  { %v2035_v9 = vpop.permute.xlu1 %2034 }
 0x550   :  { %v1915_v12 = vpop.permute.xlu0 %1914 }
 0x551   :  { %v2148_v33 = vsel %vm2139_vm3, %v2138_v4, %v1915_v12 }
 0x553   :  { %v2110_v25 = vpop.permute.xlu1 %2109 }
 0x554   :  { %v1961_v6 = vpop.permute.xlu0 %1960 }
 0x555   :  { %v2157_v42 = vsel %vm1153_vm11, %v2148_v33, %v1961_v6  ;;  %vm2427_vm11 = vcmask 130052  }
 0x556   :  { %v2167_v40 = vsel %vm2158_vm5, %v2157_v42, %v1988_v20 }
 0x557   :  { %v2177_v26 = vsel %vm2168_vm13, %v2167_v40, %v2035_v9 }
 0x558   :  { %v2081_v37 = vpop.permute.xlu0 %2080 }
 0x559   :  { %v2187_v8 = vsel %vm2178_vm14, %v2177_v26, %v2081_v37 }
 0x55a   :  { %v2196_v10 = vsel %vm1165_vm12, %v2187_v8, %v2110_v25 }
 0x55b   :  { %2930 = vmatmul.mubr.msk.f32.gmra.mrb[84].mxu1 %vm2207_vm15, %v2196_v10 }
 0x564   :  { %v2380_v51 = vpop.permute.xlu1 %2379 }
 0x568   :  { %v2400_v48 = vpop.permute.xlu1 %2399 }
 0x569   :  { %v2360_v30 = vpop.permute.xlu0 %2359 }
 0x56c   :  { %v2370_v52 = vpop.permute.xlu1 %2369 }
 0x56d   :  { %v2365_v22 = vpop.permute.xlu0 %2364 }
 0x570   :  { %v2385_v55 = vpop.permute.xlu1 %2384 }
 0x571   :  { %v2375_v14 = vpop.permute.xlu0 %2374 }
 0x574   :  { %v2395_v2 = vpop.permute.xlu1 %2394 }
 0x575   :  { %v2390_v20 = vpop.permute.xlu0 %2389 }
 0x5ae   :  { %v2304_v13 = vpop.f32.mrb[68].mxu1 }
 0x5af   :  { %v2907_v31 = vpop.f32.mrb[69].mxu1  ;;  %v2305_v28 = vadd.f32 %v2515_v3, %v2304_v13 }
 0x5b1   :  { %v2402_v7 = vadd.f32 %v2360_v30, %v2305_v28 }
 0x5b3   :  { %v2411_v43 = vsel %vm1165_vm12, %v2402_v7, -inf }
 0x5be   :  { %v2309_v41 = vpop.f32.mrb[70].mxu1 }
 0x5bf   :  { %v2910_v47 = vpop.f32.mrb[71].mxu1  ;;  %v2310_v58 = vadd.f32 %v2515_v3, %v2309_v41 }
 0x5c1   :  { %v2403_v36 = vadd.f32 %v2365_v22, %v2310_v58 }
 0x5c3   :  { %v2412_v18 = vsel %vm1165_vm12, %v2403_v36, -inf }
 0x5ce   :  { %v2314_v49 = vpop.f32.mrb[72].mxu1 }
 0x5cf   :  { %v2913_v35 = vpop.f32.mrb[73].mxu1  ;;  %v2315_v11 = vadd.f32 %v2515_v3, %v2314_v49 }
 0x5d1   :  { %v2404_v27 = vadd.f32 %v2370_v52, %v2315_v11 }
 0x5d3   :  { %v2413_v21 = vsel %vm1165_vm12, %v2404_v27, -inf }
 0x5de   :  { %v2319_v60 = vpop.f32.mrb[74].mxu1 }
 0x5df   :  { %v2320_v15 = vadd.f32 %v2515_v3, %v2319_v60  ;;  %v2916_v39 = vpop.f32.mrb[75].mxu1 }
 0x5e1   :  { %v2405_v17 = vadd.f32 %v2375_v14, %v2320_v15 }
 0x5e3   :  { %v2414_v5 = vsel %vm1165_vm12, %v2405_v17, -inf }
 0x5e4   :  { %v2419_v63 = vmax.f32 %v2413_v21, %v2414_v5 }
 0x5ee   :  { %v2324_v16 = vpop.f32.mrb[76].mxu1 }
 0x5ef   :  { %v2325_v61 = vadd.f32 %v2515_v3, %v2324_v16  ;;  %v2919_v56 = vpop.f32.mrb[77].mxu1 }
 0x5f1   :  { %v2406_v32 = vadd.f32 %v2380_v51, %v2325_v61 }
 0x5f3   :  { %v2416_v62 = vsel %vm2415_vm0, %v2406_v32, -inf  ;;  %v2428_v26 = vsel %vm2427_vm11, %v2406_v32, -inf }
 0x5f4   :  { %v2417_v53 = vmax.f32 %v2411_v43, %v2416_v62 }
 0x5f6   :  { %v2418_v45 = vmax.f32 %v2417_v53, %v2412_v18 }
 0x5f8   :  { %v2420_v19 = vmax.f32 %v2418_v45, %v2419_v63 }
 0x5fa   :  { %v2421_v6 = vrot.slane %v2420_v19, 4 }
 0x5fc   :  { %v2422_v25 = vmax.f32 %v2420_v19, %v2421_v6 }
 0x5fe   :  { %v2329_v0 = vpop.f32.mrb[78].mxu1  ;;  %v2423_v31 = vrot.slane %v2422_v25, 2 }
 0x5ff   :  { %v2922_v46 = vpop.f32.mrb[79].mxu1  ;;  %v2330_v38 = vadd.f32 %v2515_v3, %v2329_v0 }
 0x600   :  { %v2424_v49 = vmax.f32 %v2422_v25, %v2423_v31 }
 0x601   :  { %v2407_v42 = vadd.f32 %v2385_v55, %v2330_v38 }
 0x602   :  { %v2425_v30 = vrot.slane %v2424_v49, 1 }
 0x603   :  { %v2429_v10 = vsel %vm1165_vm12, %v2407_v42, -inf }
 0x604   :  { %v2426_v11 = vmax.f32 %v2424_v49, %v2425_v30 }
 0x612   :  { %v2334_v54 = vpop.f32.mrb[80].mxu1 }
 0x613   :  { %v2925_v29 = vpop.f32.mrb[81].mxu1  ;;  %v2335_v57 = vadd.f32 %v2515_v3, %v2334_v54 }
 0x615   :  { %v2408_v1 = vadd.f32 %v2390_v20, %v2335_v57 }
 0x617   :  { %v2430_v24 = vsel %vm1165_vm12, %v2408_v1, -inf }
 0x620   :  { %v2339_v59 = vpop.f32.mrb[82].mxu1 }
 0x621   :  { %v2340_v50 = vadd.f32 %v2515_v3, %v2339_v59  ;;  %v2928_v23 = vpop.f32.mrb[83].mxu1 }
 0x623   :  { %v2409_v44 = vadd.f32 %v2395_v2, %v2340_v50 }
 0x625   :  { %v2431_v34 = vsel %vm1165_vm12, %v2409_v44, -inf }
 0x626   :  { %v2435_v12 = vmax.f32 %v2430_v24, %v2431_v34 }
 0x62e   :  { %v2344_v4 = vpop.f32.mrb[84].mxu1 }
 0x62f   :  { %v2345_v9 = vadd.f32 %v2515_v3, %v2344_v4  ;;  %v2931_v33 = vpop.f32.mrb[85].mxu1 }
 0x631   :  { %v2410_v40 = vadd.f32 %v2400_v48, %v2345_v9 }
 0x633   :  { %v2432_v37 = vsel %vm1165_vm12, %v2410_v40, -inf }
 0x634   :  { %v2433_v8 = vmax.f32 %v2428_v26, %v2432_v37 }
 0x636   :  { %v2434_v13 = vmax.f32 %v2433_v8, %v2429_v10 }
 0x638   :  { %v2436_v41 = vmax.f32 %v2434_v13, %v2435_v12 }
 0x63a   :  { %v2437_v47 = vrot.slane %v2436_v41, 4 }
 0x63c   :  { %v2438_v35 = vmax.f32 %v2436_v41, %v2437_v47 }
 0x63e   :  { %v2439_v51 = vrot.slane %v2438_v35, 2 }
 0x640   :  { %v2440_v3 = vmax.f32 %v2438_v35, %v2439_v51 }
 0x642   :  { %v2441_v22 = vrot.slane %v2440_v3, 1 }
 0x644   :  { %v2442_v52 = vmax.f32 %v2440_v3, %v2441_v22 }
 0x646   :  { %v2443_v48 = vsel %vm914_vm9, %v2426_v11, %v2442_v52 }
 0x647   :  { %2445 = vst.msk [vmem:[%s4614_s15] sm:$0x3] %vm2444_vm2, %v2443_v48 }

</bundles_post_ra>
